<compile_context>
chip_gen: v5e
topology: v5e:2x2
jax: 0.10.0
libtpu: 0.0.40
codegen_flags: <defaults>
</compile_context>

<pallas_src>
import functools
import math

import jax
import jax.numpy as jnp
from jax.experimental import pallas as pl
from jax.experimental.pallas import tpu as pltpu

LN_EPS = 1e-5  # nn.LayerNorm default


def _layer_norm(x_f32, gamma, beta):
    mean = jnp.mean(x_f32, axis=-1, keepdims=True)
    var = jnp.mean(jnp.square(x_f32 - mean), axis=-1, keepdims=True)
    return (x_f32 - mean) * jax.lax.rsqrt(var + LN_EPS) * gamma + beta


def _mha_into(q_in, kv_in, tk,
              wq_ref, bq_ref, wk_ref, bk_ref, wv_ref, bv_ref,
              attn_ref, ctx_ref, q_sc, k_sc, v_sc, *, num_heads):
    """kospeech-style MultiHeadAttention (per-head scaled dot, no output proj).

    q_in:[Tq,D], kv_in:[Tk,D] in the bf16 compute dtype; weights already [in,out]
    bf16.  Per-head attention maps go to attn_ref[h, 0]; the concatenated f32
    context goes into ctx_ref[:, h*dh:(h+1)*dh] (VMEM slab).
    """
    d_model = wq_ref.shape[1]
    d_head = d_model // num_heads
    scale = jnp.float32(1.0 / math.sqrt(d_head))
    cdt = q_sc.dtype

    # Full-width projections: bf16 x bf16 -> f32 accumulation on the MXU, f32 bias,
    # then staged back to VMEM scratch in the compute dtype.  Staging through
    # scratch (instead of slicing live values per head) bounds live ranges to one
    # head and turns per-head accesses into addressed sub-block loads.
    q_sc[...] = (jnp.dot(q_in, wq_ref[...], preferred_element_type=jnp.float32)
                 + bq_ref[...]).astype(cdt)
    k_sc[0:tk, :] = (jnp.dot(kv_in, wk_ref[...], preferred_element_type=jnp.float32)
                     + bk_ref[...]).astype(cdt)
    v_sc[0:tk, :] = (jnp.dot(kv_in, wv_ref[...], preferred_element_type=jnp.float32)
                     + bv_ref[...]).astype(cdt)

    # TODO(synk): masked_fill path of ScaledDotProductAttention not implemented
    # (self_attn_mask / encoder_attn_mask are None here).
    for h in range(num_heads):                       # short static loop, unrolled
        sl = slice(h * d_head, (h + 1) * d_head)
        # score = q_h @ k_h^T without materializing a transpose (contract d_head).
        score = jax.lax.dot_general(
            q_sc[:, sl], k_sc[0:tk, sl],
            dimension_numbers=(((1,), (1,)), ((), ())),
            preferred_element_type=jnp.float32) * scale
        score = score - jnp.max(score, axis=-1, keepdims=True)
        e = jnp.exp(score)                           # f32 softmax (v5e-safe)
        # approx=True -> EUP vrcp slot; frees VALU in the softmax-bound region.
        attn = e * pl.reciprocal(jnp.sum(e, axis=-1, keepdims=True), approx=True)
        attn_ref[h, 0] = attn.astype(attn_ref.dtype)
        ctx_ref[:, sl] = jnp.dot(attn.astype(cdt), v_sc[0:tk, sl],
                                 preferred_element_type=jnp.float32)


def decoder_layer_kernel(
        inp_ref, enc_ref,
        # self-attention params
        s_wq_ref, s_bq_ref, s_wk_ref, s_bk_ref, s_wv_ref, s_bv_ref, s_g_ref, s_b_ref,
        # encoder-decoder attention params
        c_wq_ref, c_bq_ref, c_wk_ref, c_bk_ref, c_wv_ref, c_bv_ref, c_g_ref, c_b_ref,
        # feed-forward params
        f_w1_ref, f_b1_ref, f_w2_ref, f_b2_ref, f_g_ref, f_b_ref,
        # outputs
        out_ref, self_attn_ref, cross_attn_ref,
        # scratch
        q_sc, k_sc, v_sc, ctx_sc,
        *, num_heads):
    cdt = q_sc.dtype
    td = inp_ref.shape[1]
    te = enc_ref.shape[1]

    x = inp_ref[0]                       # [Td, D] input dtype
    x_c = x.astype(cdt)                  # MXU input (bf16)
    x_f32 = x.astype(jnp.float32)        # residual, hoisted once and reused

    # ---- self-attention + AddNorm ------------------------------------------
    _mha_into(x_c, x_c, td,
              s_wq_ref, s_bq_ref, s_wk_ref, s_bk_ref, s_wv_ref, s_bv_ref,
              self_attn_ref, ctx_sc, q_sc, k_sc, v_sc, num_heads=num_heads)
    h1 = _layer_norm(ctx_sc[...] + x_f32, s_g_ref[...], s_b_ref[...])       # f32

    # ---- encoder-decoder attention + AddNorm --------------------------------
    enc_c = enc_ref[0].astype(cdt)
    _mha_into(h1.astype(cdt), enc_c, te,
              c_wq_ref, c_bq_ref, c_wk_ref, c_bk_ref, c_wv_ref, c_bv_ref,
              cross_attn_ref, ctx_sc, q_sc, k_sc, v_sc, num_heads=num_heads)
    h2 = _layer_norm(ctx_sc[...] + h1, c_g_ref[...], c_b_ref[...])          # f32

    # ---- position-wise FFN ('ff' style) + AddNorm (dropout = identity) ------
    ff = jnp.dot(h2.astype(cdt), f_w1_ref[...],
                 preferred_element_type=jnp.float32) + f_b1_ref[...]
    ff = jnp.maximum(ff, 0.0)
    y = jnp.dot(ff.astype(cdt), f_w2_ref[...],
                preferred_element_type=jnp.float32) + f_b2_ref[...]
    out_ref[0] = _layer_norm(y + h2, f_g_ref[...], f_b_ref[...]).astype(out_ref.dtype)


def _vmem_limit_bytes(td, te, d_model, d_ff, num_heads, in_dt, w_dt, attn_dt):
    """Rough resident-footprint estimate (weights + acts + outs double-buffered
    by the pipeline, plus scratch), with headroom; capped at 64 MiB (v7x-safe)."""
    ib = jnp.dtype(in_dt).itemsize
    wb = jnp.dtype(w_dt).itemsize
    ab = jnp.dtype(attn_dt).itemsize
    weights = (6 * d_model * d_model + 2 * d_model * d_ff) * wb
    smalls = (8 * d_model + d_ff) * 4
    acts_in = (td + te) * d_model * ib
    outs = td * d_model * ib + num_heads * td * (td + te) * ab
    scratch = (td + 2 * max(td, te)) * d_model * wb + td * d_model * 4
    total = 2 * (weights + smalls + acts_in + outs) + scratch
    return int(min(64 << 20, max(32 << 20, int(1.5 * total))))


@functools.partial(jax.jit, static_argnames=("num_heads", "attn_dtype"))
def speech_transformer_decoder_layer(inputs, encoder_outputs, params, *,
                                     num_heads, attn_dtype=jnp.float32):
    """params must come from prepare_params() (weights [in,out], bf16)."""
    B, Td, D = inputs.shape
    Te = encoder_outputs.shape[1]
    sa, ca, ff = params["self_attn"], params["cross_attn"], params["ffn"]
    d_ff = ff["w1"].shape[1]                 # prepared weights are [in, out]
    compute_dtype = sa["wq"].dtype
    Tkv = max(Td, Te)

    args = (
        inputs, encoder_outputs,
        sa["wq"], sa["bq"], sa["wk"], sa["bk"], sa["wv"], sa["bv"],
        sa["gamma"], sa["beta"],
        ca["wq"], ca["bq"], ca["wk"], ca["bk"], ca["wv"], ca["bv"],
        ca["gamma"], ca["beta"],
        ff["w1"], ff["b1"], ff["w2"], ff["b2"], ff["gamma"], ff["beta"],
    )

    full2 = lambda b: (0, 0)
    vec_spec = pl.BlockSpec((1, D), full2)
    sq_spec = pl.BlockSpec((D, D), full2)
    attn_param_specs = [sq_spec, vec_spec, sq_spec, vec_spec, sq_spec, vec_spec,
                        vec_spec, vec_spec]

    kernel = functools.partial(decoder_layer_kernel, num_heads=num_heads)

    # TODO(synk): for long sequences / large d_ff, tile the decoder time axis
    # (grid=(B, cdiv(Td, tT)), tT multiple of 8) so the [Td, d_ff] FFN
    # intermediate and the attention-map buffers stay bounded on v7x (64 MiB VMEM)
    # and both v7x TensorCores get parallel work when B is 1-2.
    out, self_attn, cross_attn = pl.pallas_call(
        kernel,
        out_shape=(
            jax.ShapeDtypeStruct((B, Td, D), inputs.dtype),
            jax.ShapeDtypeStruct((num_heads, B, Td, Td), attn_dtype),
            jax.ShapeDtypeStruct((num_heads, B, Td, Te), attn_dtype),
        ),
        grid=(B,),
        in_specs=(
            [pl.BlockSpec((1, Td, D), lambda b: (b, 0, 0)),
             pl.BlockSpec((1, Te, D), lambda b: (b, 0, 0))]
            + attn_param_specs            # self-attention
            + attn_param_specs            # cross-attention
            + [pl.BlockSpec((D, d_ff), full2), pl.BlockSpec((1, d_ff), full2),
               pl.BlockSpec((d_ff, D), full2), vec_spec, vec_spec, vec_spec]
        ),
        out_specs=(
            pl.BlockSpec((1, Td, D), lambda b: (b, 0, 0)),
            pl.BlockSpec((num_heads, 1, Td, Td), lambda b: (0, b, 0, 0)),
            pl.BlockSpec((num_heads, 1, Td, Te), lambda b: (0, b, 0, 0)),
        ),
        scratch_shapes=[
            pltpu.VMEM((Td, D), compute_dtype),    # Q (current sub-layer)
            pltpu.VMEM((Tkv, D), compute_dtype),   # K (self or cross)
            pltpu.VMEM((Tkv, D), compute_dtype),   # V (self or cross)
            pltpu.VMEM((Td, D), jnp.float32),      # concatenated context
        ],
        compiler_params=pltpu.CompilerParams(
            dimension_semantics=("parallel",),
            vmem_limit_bytes=_vmem_limit_bytes(
                Td, Te, D, d_ff, num_heads, inputs.dtype, compute_dtype, attn_dtype)),
    )(*args)

    # Torch/kospeech returns attention maps as (num_heads*batch, Tq, Tk), head-major.
    return (out,
            self_attn.reshape(num_heads * B, Td, Td),
            cross_attn.reshape(num_heads * B, Td, Te))


# -----------------------------------------------------------------------------
# One-time parameter preparation: torch [out,in] -> [in,out], weights cast to the
# MXU compute dtype (bf16).  Biases / LayerNorm affine stay f32 (applied after f32
# accumulation).  Call ONCE, not per forward step.
# -----------------------------------------------------------------------------
def prepare_params(params, compute_dtype=jnp.bfloat16):
    def prep_attn(p):
        return dict(
            wq=jnp.asarray(p["wq"]).T.astype(compute_dtype),
            wk=jnp.asarray(p["wk"]).T.astype(compute_dtype),
            wv=jnp.asarray(p["wv"]).T.astype(compute_dtype),
            bq=jnp.asarray(p["bq"], jnp.float32),
            bk=jnp.asarray(p["bk"], jnp.float32),
            bv=jnp.asarray(p["bv"], jnp.float32),
            gamma=jnp.asarray(p["gamma"], jnp.float32),
            beta=jnp.asarray(p["beta"], jnp.float32),
        )

    ff = params["ffn"]
    return dict(
        self_attn=prep_attn(params["self_attn"]),
        cross_attn=prep_attn(params["cross_attn"]),
        ffn=dict(
            w1=jnp.asarray(ff["w1"]).T.astype(compute_dtype),
            w2=jnp.asarray(ff["w2"]).T.astype(compute_dtype),
            b1=jnp.asarray(ff["b1"], jnp.float32),
            b2=jnp.asarray(ff["b2"], jnp.float32),
            gamma=jnp.asarray(ff["gamma"], jnp.float32),
            beta=jnp.asarray(ff["beta"], jnp.float32),
        ),
    )


# -----------------------------------------------------------------------------
# Deterministic synthetic parameters (PyTorch nn.Linear convention W:[out,in]).
# -----------------------------------------------------------------------------
def init_params(key, d_model, d_ff):
    ks = jax.random.split(key, 8)

    def lin(k, out_f, in_f):
        kw, kb = jax.random.split(k)
        w = jax.random.normal(kw, (out_f, in_f), jnp.float32) * 0.05
        b = jax.random.normal(kb, (1, out_f), jnp.float32) * 0.05
        return w, b

    def mha(k):
        k1, k2, k3 = jax.random.split(k, 3)
        wq, bq = lin(k1, d_model, d_model)
        wk, bk = lin(k2, d_model, d_model)
        wv, bv = lin(k3, d_model, d_model)
        return dict(wq=wq, bq=bq, wk=wk, bk=bk, wv=wv, bv=bv,
                    gamma=jnp.ones((1, d_model), jnp.float32),
                    beta=jnp.zeros((1, d_model), jnp.float32))

    p = {"self_attn": mha(ks[0]), "cross_attn": mha(ks[1])}
    w1, b1 = lin(ks[2], d_ff, d_model)
    w2, b2 = lin(ks[3], d_model, d_ff)
    p["ffn"] = dict(w1=w1, b1=b1, w2=w2, b2=b2,
                    gamma=jnp.ones((1, d_model), jnp.float32),
                    beta=jnp.zeros((1, d_model), jnp.float32))
    return p


if __name__ == "__main__":
    B, T_dec, T_enc = 2, 8, 16
    d_model, num_heads, d_ff = 32, 4, 64

    key = jax.random.PRNGKey(0)
    k_in, k_enc, k_par = jax.random.split(key, 3)
    inputs = jax.random.normal(k_in, (B, T_dec, d_model), jnp.float32)
    encoder_outputs = jax.random.normal(k_enc, (B, T_enc, d_model), jnp.float32)

    raw_params = init_params(k_par, d_model, d_ff)
    params = prepare_params(raw_params, compute_dtype=jnp.bfloat16)  # one-time prep

    output, self_attn, enc_dec_attn = speech_transformer_decoder_layer(
        inputs, encoder_outputs, params, num_heads=num_heads)

    jax.block_until_ready((output, self_attn, enc_dec_attn))
    assert output.shape == (B, T_dec, d_model)
    assert self_attn.shape == (B * num_heads, T_dec, T_dec)
    assert enc_dec_attn.shape == (B * num_heads, T_dec, T_enc)
    assert bool(jnp.all(jnp.isfinite(output)))
    assert bool(jnp.all(jnp.isfinite(self_attn)))
    assert bool(jnp.all(jnp.isfinite(enc_dec_attn)))
    print("KERNEL_OK")
</pallas_src>

<mosaic_0001>
module attributes {stable_mosaic.version = 11 : i64} {
  func.func @decoder_layer_kernel(%arg0: i32, %arg1: memref<1x8x32xf32, #tpu.memory_space<vmem>>, %arg2: memref<1x16x32xf32, #tpu.memory_space<vmem>>, %arg3: memref<32x32xbf16, #tpu.memory_space<vmem>>, %arg4: memref<1x32xf32, #tpu.memory_space<vmem>>, %arg5: memref<32x32xbf16, #tpu.memory_space<vmem>>, %arg6: memref<1x32xf32, #tpu.memory_space<vmem>>, %arg7: memref<32x32xbf16, #tpu.memory_space<vmem>>, %arg8: memref<1x32xf32, #tpu.memory_space<vmem>>, %arg9: memref<1x32xf32, #tpu.memory_space<vmem>>, %arg10: memref<1x32xf32, #tpu.memory_space<vmem>>, %arg11: memref<32x32xbf16, #tpu.memory_space<vmem>>, %arg12: memref<1x32xf32, #tpu.memory_space<vmem>>, %arg13: memref<32x32xbf16, #tpu.memory_space<vmem>>, %arg14: memref<1x32xf32, #tpu.memory_space<vmem>>, %arg15: memref<32x32xbf16, #tpu.memory_space<vmem>>, %arg16: memref<1x32xf32, #tpu.memory_space<vmem>>, %arg17: memref<1x32xf32, #tpu.memory_space<vmem>>, %arg18: memref<1x32xf32, #tpu.memory_space<vmem>>, %arg19: memref<32x64xbf16, #tpu.memory_space<vmem>>, %arg20: memref<1x64xf32, #tpu.memory_space<vmem>>, %arg21: memref<64x32xbf16, #tpu.memory_space<vmem>>, %arg22: memref<1x32xf32, #tpu.memory_space<vmem>>, %arg23: memref<1x32xf32, #tpu.memory_space<vmem>>, %arg24: memref<1x32xf32, #tpu.memory_space<vmem>>, %arg25: memref<1x8x32xf32, #tpu.memory_space<vmem>>, %arg26: memref<4x1x8x8xf32, #tpu.memory_space<vmem>>, %arg27: memref<4x1x8x16xf32, #tpu.memory_space<vmem>>, %arg28: memref<8x32xbf16, #tpu.memory_space<vmem>>, %arg29: memref<16x32xbf16, #tpu.memory_space<vmem>>, %arg30: memref<16x32xbf16, #tpu.memory_space<vmem>>, %arg31: memref<8x32xf32, #tpu.memory_space<vmem>>) attributes {dimension_semantics = [#tpu.dimension_semantics<parallel>], iteration_bounds = array<i64: 2>, scalar_prefetch = 0 : i64, scratch_operands = 4 : i64, tpu.core_type = #tpu.core_type<tc>, window_params = [{transform_indices = @transform_0, window_bounds = array<i64: 1, 8, 32>}, {transform_indices = @transform_1, window_bounds = array<i64: 1, 16, 32>}, {pipeline_mode = #tpu.pipeline_mode<synchronous>, transform_indices = @transform_2, window_bounds = array<i64: 32, 32>}, {pipeline_mode = #tpu.pipeline_mode<synchronous>, transform_indices = @transform_3, window_bounds = array<i64: 1, 32>}, {pipeline_mode = #tpu.pipeline_mode<synchronous>, transform_indices = @transform_4, window_bounds = array<i64: 32, 32>}, {pipeline_mode = #tpu.pipeline_mode<synchronous>, transform_indices = @transform_5, window_bounds = array<i64: 1, 32>}, {pipeline_mode = #tpu.pipeline_mode<synchronous>, transform_indices = @transform_6, window_bounds = array<i64: 32, 32>}, {pipeline_mode = #tpu.pipeline_mode<synchronous>, transform_indices = @transform_7, window_bounds = array<i64: 1, 32>}, {pipeline_mode = #tpu.pipeline_mode<synchronous>, transform_indices = @transform_8, window_bounds = array<i64: 1, 32>}, {pipeline_mode = #tpu.pipeline_mode<synchronous>, transform_indices = @transform_9, window_bounds = array<i64: 1, 32>}, {pipeline_mode = #tpu.pipeline_mode<synchronous>, transform_indices = @transform_10, window_bounds = array<i64: 32, 32>}, {pipeline_mode = #tpu.pipeline_mode<synchronous>, transform_indices = @transform_11, window_bounds = array<i64: 1, 32>}, {pipeline_mode = #tpu.pipeline_mode<synchronous>, transform_indices = @transform_12, window_bounds = array<i64: 32, 32>}, {pipeline_mode = #tpu.pipeline_mode<synchronous>, transform_indices = @transform_13, window_bounds = array<i64: 1, 32>}, {pipeline_mode = #tpu.pipeline_mode<synchronous>, transform_indices = @transform_14, window_bounds = array<i64: 32, 32>}, {pipeline_mode = #tpu.pipeline_mode<synchronous>, transform_indices = @transform_15, window_bounds = array<i64: 1, 32>}, {pipeline_mode = #tpu.pipeline_mode<synchronous>, transform_indices = @transform_16, window_bounds = array<i64: 1, 32>}, {pipeline_mode = #tpu.pipeline_mode<synchronous>, transform_indices = @transform_17, window_bounds = array<i64: 1, 32>}, {pipeline_mode = #tpu.pipeline_mode<synchronous>, transform_indices = @transform_18, window_bounds = array<i64: 32, 64>}, {pipeline_mode = #tpu.pipeline_mode<synchronous>, transform_indices = @transform_19, window_bounds = array<i64: 1, 64>}, {pipeline_mode = #tpu.pipeline_mode<synchronous>, transform_indices = @transform_20, window_bounds = array<i64: 64, 32>}, {pipeline_mode = #tpu.pipeline_mode<synchronous>, transform_indices = @transform_21, window_bounds = array<i64: 1, 32>}, {pipeline_mode = #tpu.pipeline_mode<synchronous>, transform_indices = @transform_22, window_bounds = array<i64: 1, 32>}, {pipeline_mode = #tpu.pipeline_mode<synchronous>, transform_indices = @transform_23, window_bounds = array<i64: 1, 32>}, {transform_indices = @transform_24, window_bounds = array<i64: 1, 8, 32>}, {transform_indices = @transform_25, window_bounds = array<i64: 4, 1, 8, 8>}, {transform_indices = @transform_26, window_bounds = array<i64: 4, 1, 8, 16>}]} {
    %c0 = arith.constant 0 : index
    %c0_0 = arith.constant 0 : index
    %c0_1 = arith.constant 0 : index
    %0 = vector.load %arg1[%c0, %c0_0, %c0_1] : memref<1x8x32xf32, #tpu.memory_space<vmem>>, vector<1x8x32xf32>
    %1 = vector.shape_cast %0 : vector<1x8x32xf32> to vector<8x32xf32>
    %2 = arith.truncf %1 : vector<8x32xf32> to vector<8x32xbf16>
    %c0_2 = arith.constant 0 : index
    %c0_3 = arith.constant 0 : index
    %3 = vector.load %arg3[%c0_2, %c0_3] : memref<32x32xbf16, #tpu.memory_space<vmem>>, vector<32x32xbf16>
    %cst = arith.constant dense<0.000000e+00> : vector<8x32xf32>
    %4 = tpu.matmul %2, %3, %cst {dimension_numbers = #tpu.dot_dimension_numbers<[1], [0], [0], [1], [0, 0, 1, 1], [], []>} : vector<8x32xbf16>, vector<32x32xbf16>, vector<8x32xf32> -> vector<8x32xf32>
    %c0_4 = arith.constant 0 : index
    %c0_5 = arith.constant 0 : index
    %5 = vector.load %arg4[%c0_4, %c0_5] : memref<1x32xf32, #tpu.memory_space<vmem>>, vector<1x32xf32>
    %6 = vector.broadcast %5 : vector<1x32xf32> to vector<8x32xf32>
    %7 = arith.addf %4, %6 : vector<8x32xf32>
    %8 = arith.truncf %7 : vector<8x32xf32> to vector<8x32xbf16>
    %c0_6 = arith.constant 0 : index
    %c0_7 = arith.constant 0 : index
    %9 = vector.load %arg28[%c0_6, %c0_7] : memref<8x32xbf16, #tpu.memory_space<vmem>>, vector<8x32xbf16>
    tpu.vector_store %arg28[%c0_6, %c0_7], %8 {strides = array<i32>} : memref<8x32xbf16, #tpu.memory_space<vmem>>, vector<8x32xbf16>,
    %c0_8 = arith.constant 0 : index
    %c0_9 = arith.constant 0 : index
    %10 = vector.load %arg5[%c0_8, %c0_9] : memref<32x32xbf16, #tpu.memory_space<vmem>>, vector<32x32xbf16>
    %cst_10 = arith.constant dense<0.000000e+00> : vector<8x32xf32>
    %11 = tpu.matmul %2, %10, %cst_10 {dimension_numbers = #tpu.dot_dimension_numbers<[1], [0], [0], [1], [0, 0, 1, 1], [], []>} : vector<8x32xbf16>, vector<32x32xbf16>, vector<8x32xf32> -> vector<8x32xf32>
    %c0_11 = arith.constant 0 : index
    %c0_12 = arith.constant 0 : index
    %12 = vector.load %arg6[%c0_11, %c0_12] : memref<1x32xf32, #tpu.memory_space<vmem>>, vector<1x32xf32>
    %13 = vector.broadcast %12 : vector<1x32xf32> to vector<8x32xf32>
    %14 = arith.addf %11, %13 : vector<8x32xf32>
    %15 = arith.truncf %14 : vector<8x32xf32> to vector<8x32xbf16>
    %c0_13 = arith.constant 0 : index
    %c0_14 = arith.constant 0 : index
    %16 = vector.load %arg29[%c0_13, %c0_14] : memref<16x32xbf16, #tpu.memory_space<vmem>>, vector<8x32xbf16>
    tpu.vector_store %arg29[%c0_13, %c0_14], %15 {strides = array<i32>} : memref<16x32xbf16, #tpu.memory_space<vmem>>, vector<8x32xbf16>,
    %c0_15 = arith.constant 0 : index
    %c0_16 = arith.constant 0 : index
    %17 = vector.load %arg7[%c0_15, %c0_16] : memref<32x32xbf16, #tpu.memory_space<vmem>>, vector<32x32xbf16>
    %cst_17 = arith.constant dense<0.000000e+00> : vector<8x32xf32>
    %18 = tpu.matmul %2, %17, %cst_17 {dimension_numbers = #tpu.dot_dimension_numbers<[1], [0], [0], [1], [0, 0, 1, 1], [], []>} : vector<8x32xbf16>, vector<32x32xbf16>, vector<8x32xf32> -> vector<8x32xf32>
    %c0_18 = arith.constant 0 : index
    %c0_19 = arith.constant 0 : index
    %19 = vector.load %arg8[%c0_18, %c0_19] : memref<1x32xf32, #tpu.memory_space<vmem>>, vector<1x32xf32>
    %20 = vector.broadcast %19 : vector<1x32xf32> to vector<8x32xf32>
    %21 = arith.addf %18, %20 : vector<8x32xf32>
    %22 = arith.truncf %21 : vector<8x32xf32> to vector<8x32xbf16>
    %c0_20 = arith.constant 0 : index
    %c0_21 = arith.constant 0 : index
    %23 = vector.load %arg30[%c0_20, %c0_21] : memref<16x32xbf16, #tpu.memory_space<vmem>>, vector<8x32xbf16>
    tpu.vector_store %arg30[%c0_20, %c0_21], %22 {strides = array<i32>} : memref<16x32xbf16, #tpu.memory_space<vmem>>, vector<8x32xbf16>,
    %c0_22 = arith.constant 0 : index
    %c0_23 = arith.constant 0 : index
    %24 = vector.load %arg28[%c0_22, %c0_23] : memref<8x32xbf16, #tpu.memory_space<vmem>>, vector<8x8xbf16>
    %c0_24 = arith.constant 0 : index
    %c0_25 = arith.constant 0 : index
    %25 = vector.load %arg29[%c0_24, %c0_25] : memref<16x32xbf16, #tpu.memory_space<vmem>>, vector<8x8xbf16>
    %cst_26 = arith.constant dense<0.000000e+00> : vector<8x8xf32>
    %26 = tpu.matmul %24, %25, %cst_26 {dimension_numbers = #tpu.dot_dimension_numbers<[1], [1], [0], [0], [0, 0, 1, 0], [], []>} : vector<8x8xbf16>, vector<8x8xbf16>, vector<8x8xf32> -> vector<8x8xf32>
    %cst_27 = arith.constant 0.353553385 : f32
    %27 = vector.broadcast %cst_27 : f32 to vector<8x8xf32>
    %28 = arith.mulf %26, %27 : vector<8x8xf32>
    %cst_28 = arith.constant dense<0xFF800000> : vector<8xf32>
    %29 = vector.multi_reduction <maximumf>, %28, %cst_28 [1] : vector<8x8xf32> to vector<8xf32>
    %30 = vector.shape_cast %29 : vector<8xf32> to vector<8x1xf32>
    %31 = vector.broadcast %30 : vector<8x1xf32> to vector<8x8xf32>
    %32 = arith.subf %28, %31 : vector<8x8xf32>
    %33 = math.exp %32 : vector<8x8xf32>
    %cst_29 = arith.constant dense<0.000000e+00> : vector<8xf32>
    %34 = vector.multi_reduction <add>, %33, %cst_29 [1] : vector<8x8xf32> to vector<8xf32>
    %35 = vector.shape_cast %34 : vector<8xf32> to vector<8x1xf32>
    %36 = tpu.reciprocal %35 {approx = true} : vector<8x1xf32> -> vector<8x1xf32>
    %37 = vector.broadcast %36 : vector<8x1xf32> to vector<8x8xf32>
    %38 = arith.mulf %33, %37 : vector<8x8xf32>
    %c0_30 = arith.constant 0 : index
    %c0_31 = arith.constant 0 : index
    %c0_32 = arith.constant 0 : index
    %c0_33 = arith.constant 0 : index
    %39 = vector.load %arg26[%c0_30, %c0_31, %c0_32, %c0_33] : memref<4x1x8x8xf32, #tpu.memory_space<vmem>>, vector<1x1x8x8xf32>
    %40 = vector.shape_cast %39 : vector<1x1x8x8xf32> to vector<8x8xf32>
    %41 = vector.shape_cast %38 : vector<8x8xf32> to vector<1x1x8x8xf32>
    tpu.vector_store %arg26[%c0_30, %c0_31, %c0_32, %c0_33], %41 {strides = array<i32>} : memref<4x1x8x8xf32, #tpu.memory_space<vmem>>, vector<1x1x8x8xf32>,
    %42 = arith.truncf %38 : vector<8x8xf32> to vector<8x8xbf16>
    %c0_34 = arith.constant 0 : index
    %c0_35 = arith.constant 0 : index
    %43 = vector.load %arg30[%c0_34, %c0_35] : memref<16x32xbf16, #tpu.memory_space<vmem>>, vector<8x8xbf16>
    %cst_36 = arith.constant dense<0.000000e+00> : vector<8x8xf32>
    %44 = tpu.matmul %42, %43, %cst_36 {dimension_numbers = #tpu.dot_dimension_numbers<[1], [0], [0], [1], [0, 0, 1, 1], [], []>} : vector<8x8xbf16>, vector<8x8xbf16>, vector<8x8xf32> -> vector<8x8xf32>
    %c0_37 = arith.constant 0 : index
    %c0_38 = arith.constant 0 : index
    %45 = vector.load %arg31[%c0_37, %c0_38] : memref<8x32xf32, #tpu.memory_space<vmem>>, vector<8x8xf32>
    tpu.vector_store %arg31[%c0_37, %c0_38], %44 {strides = array<i32>} : memref<8x32xf32, #tpu.memory_space<vmem>>, vector<8x8xf32>,
    %c0_39 = arith.constant 0 : index
    %c8 = arith.constant 8 : index
    %46 = vector.load %arg28[%c0_39, %c8] : memref<8x32xbf16, #tpu.memory_space<vmem>>, vector<8x8xbf16>
    %c0_40 = arith.constant 0 : index
    %c8_41 = arith.constant 8 : index
    %47 = vector.load %arg29[%c0_40, %c8_41] : memref<16x32xbf16, #tpu.memory_space<vmem>>, vector<8x8xbf16>
    %cst_42 = arith.constant dense<0.000000e+00> : vector<8x8xf32>
    %48 = tpu.matmul %46, %47, %cst_42 {dimension_numbers = #tpu.dot_dimension_numbers<[1], [1], [0], [0], [0, 0, 1, 0], [], []>} : vector<8x8xbf16>, vector<8x8xbf16>, vector<8x8xf32> -> vector<8x8xf32>
    %cst_43 = arith.constant 0.353553385 : f32
    %49 = vector.broadcast %cst_43 : f32 to vector<8x8xf32>
    %50 = arith.mulf %48, %49 : vector<8x8xf32>
    %cst_44 = arith.constant dense<0xFF800000> : vector<8xf32>
    %51 = vector.multi_reduction <maximumf>, %50, %cst_44 [1] : vector<8x8xf32> to vector<8xf32>
    %52 = vector.shape_cast %51 : vector<8xf32> to vector<8x1xf32>
    %53 = vector.broadcast %52 : vector<8x1xf32> to vector<8x8xf32>
    %54 = arith.subf %50, %53 : vector<8x8xf32>
    %55 = math.exp %54 : vector<8x8xf32>
    %cst_45 = arith.constant dense<0.000000e+00> : vector<8xf32>
    %56 = vector.multi_reduction <add>, %55, %cst_45 [1] : vector<8x8xf32> to vector<8xf32>
    %57 = vector.shape_cast %56 : vector<8xf32> to vector<8x1xf32>
    %58 = tpu.reciprocal %57 {approx = true} : vector<8x1xf32> -> vector<8x1xf32>
    %59 = vector.broadcast %58 : vector<8x1xf32> to vector<8x8xf32>
    %60 = arith.mulf %55, %59 : vector<8x8xf32>
    %c1 = arith.constant 1 : index
    %c0_46 = arith.constant 0 : index
    %c0_47 = arith.constant 0 : index
    %c0_48 = arith.constant 0 : index
    %61 = vector.load %arg26[%c1, %c0_46, %c0_47, %c0_48] : memref<4x1x8x8xf32, #tpu.memory_space<vmem>>, vector<1x1x8x8xf32>
    %62 = vector.shape_cast %61 : vector<1x1x8x8xf32> to vector<8x8xf32>
    %63 = vector.shape_cast %60 : vector<8x8xf32> to vector<1x1x8x8xf32>
    tpu.vector_store %arg26[%c1, %c0_46, %c0_47, %c0_48], %63 {strides = array<i32>} : memref<4x1x8x8xf32, #tpu.memory_space<vmem>>, vector<1x1x8x8xf32>,
    %64 = arith.truncf %60 : vector<8x8xf32> to vector<8x8xbf16>
    %c0_49 = arith.constant 0 : index
    %c8_50 = arith.constant 8 : index
    %65 = vector.load %arg30[%c0_49, %c8_50] : memref<16x32xbf16, #tpu.memory_space<vmem>>, vector<8x8xbf16>
    %cst_51 = arith.constant dense<0.000000e+00> : vector<8x8xf32>
    %66 = tpu.matmul %64, %65, %cst_51 {dimension_numbers = #tpu.dot_dimension_numbers<[1], [0], [0], [1], [0, 0, 1, 1], [], []>} : vector<8x8xbf16>, vector<8x8xbf16>, vector<8x8xf32> -> vector<8x8xf32>
    %c0_52 = arith.constant 0 : index
    %c8_53 = arith.constant 8 : index
    %67 = vector.load %arg31[%c0_52, %c8_53] : memref<8x32xf32, #tpu.memory_space<vmem>>, vector<8x8xf32>
    tpu.vector_store %arg31[%c0_52, %c8_53], %66 {strides = array<i32>} : memref<8x32xf32, #tpu.memory_space<vmem>>, vector<8x8xf32>,
    %c0_54 = arith.constant 0 : index
    %c16 = arith.constant 16 : index
    %68 = vector.load %arg28[%c0_54, %c16] : memref<8x32xbf16, #tpu.memory_space<vmem>>, vector<8x8xbf16>
    %c0_55 = arith.constant 0 : index
    %c16_56 = arith.constant 16 : index
    %69 = vector.load %arg29[%c0_55, %c16_56] : memref<16x32xbf16, #tpu.memory_space<vmem>>, vector<8x8xbf16>
    %cst_57 = arith.constant dense<0.000000e+00> : vector<8x8xf32>
    %70 = tpu.matmul %68, %69, %cst_57 {dimension_numbers = #tpu.dot_dimension_numbers<[1], [1], [0], [0], [0, 0, 1, 0], [], []>} : vector<8x8xbf16>, vector<8x8xbf16>, vector<8x8xf32> -> vector<8x8xf32>
    %cst_58 = arith.constant 0.353553385 : f32
    %71 = vector.broadcast %cst_58 : f32 to vector<8x8xf32>
    %72 = arith.mulf %70, %71 : vector<8x8xf32>
    %cst_59 = arith.constant dense<0xFF800000> : vector<8xf32>
    %73 = vector.multi_reduction <maximumf>, %72, %cst_59 [1] : vector<8x8xf32> to vector<8xf32>
    %74 = vector.shape_cast %73 : vector<8xf32> to vector<8x1xf32>
    %75 = vector.broadcast %74 : vector<8x1xf32> to vector<8x8xf32>
    %76 = arith.subf %72, %75 : vector<8x8xf32>
    %77 = math.exp %76 : vector<8x8xf32>
    %cst_60 = arith.constant dense<0.000000e+00> : vector<8xf32>
    %78 = vector.multi_reduction <add>, %77, %cst_60 [1] : vector<8x8xf32> to vector<8xf32>
    %79 = vector.shape_cast %78 : vector<8xf32> to vector<8x1xf32>
    %80 = tpu.reciprocal %79 {approx = true} : vector<8x1xf32> -> vector<8x1xf32>
    %81 = vector.broadcast %80 : vector<8x1xf32> to vector<8x8xf32>
    %82 = arith.mulf %77, %81 : vector<8x8xf32>
    %c2 = arith.constant 2 : index
    %c0_61 = arith.constant 0 : index
    %c0_62 = arith.constant 0 : index
    %c0_63 = arith.constant 0 : index
    %83 = vector.load %arg26[%c2, %c0_61, %c0_62, %c0_63] : memref<4x1x8x8xf32, #tpu.memory_space<vmem>>, vector<1x1x8x8xf32>
    %84 = vector.shape_cast %83 : vector<1x1x8x8xf32> to vector<8x8xf32>
    %85 = vector.shape_cast %82 : vector<8x8xf32> to vector<1x1x8x8xf32>
    tpu.vector_store %arg26[%c2, %c0_61, %c0_62, %c0_63], %85 {strides = array<i32>} : memref<4x1x8x8xf32, #tpu.memory_space<vmem>>, vector<1x1x8x8xf32>,
    %86 = arith.truncf %82 : vector<8x8xf32> to vector<8x8xbf16>
    %c0_64 = arith.constant 0 : index
    %c16_65 = arith.constant 16 : index
    %87 = vector.load %arg30[%c0_64, %c16_65] : memref<16x32xbf16, #tpu.memory_space<vmem>>, vector<8x8xbf16>
    %cst_66 = arith.constant dense<0.000000e+00> : vector<8x8xf32>
    %88 = tpu.matmul %86, %87, %cst_66 {dimension_numbers = #tpu.dot_dimension_numbers<[1], [0], [0], [1], [0, 0, 1, 1], [], []>} : vector<8x8xbf16>, vector<8x8xbf16>, vector<8x8xf32> -> vector<8x8xf32>
    %c0_67 = arith.constant 0 : index
    %c16_68 = arith.constant 16 : index
    %89 = vector.load %arg31[%c0_67, %c16_68] : memref<8x32xf32, #tpu.memory_space<vmem>>, vector<8x8xf32>
    tpu.vector_store %arg31[%c0_67, %c16_68], %88 {strides = array<i32>} : memref<8x32xf32, #tpu.memory_space<vmem>>, vector<8x8xf32>,
    %c0_69 = arith.constant 0 : index
    %c24 = arith.constant 24 : index
    %90 = vector.load %arg28[%c0_69, %c24] : memref<8x32xbf16, #tpu.memory_space<vmem>>, vector<8x8xbf16>
    %c0_70 = arith.constant 0 : index
    %c24_71 = arith.constant 24 : index
    %91 = vector.load %arg29[%c0_70, %c24_71] : memref<16x32xbf16, #tpu.memory_space<vmem>>, vector<8x8xbf16>
    %cst_72 = arith.constant dense<0.000000e+00> : vector<8x8xf32>
    %92 = tpu.matmul %90, %91, %cst_72 {dimension_numbers = #tpu.dot_dimension_numbers<[1], [1], [0], [0], [0, 0, 1, 0], [], []>} : vector<8x8xbf16>, vector<8x8xbf16>, vector<8x8xf32> -> vector<8x8xf32>
    %cst_73 = arith.constant 0.353553385 : f32
    %93 = vector.broadcast %cst_73 : f32 to vector<8x8xf32>
    %94 = arith.mulf %92, %93 : vector<8x8xf32>
    %cst_74 = arith.constant dense<0xFF800000> : vector<8xf32>
    %95 = vector.multi_reduction <maximumf>, %94, %cst_74 [1] : vector<8x8xf32> to vector<8xf32>
    %96 = vector.shape_cast %95 : vector<8xf32> to vector<8x1xf32>
    %97 = vector.broadcast %96 : vector<8x1xf32> to vector<8x8xf32>
    %98 = arith.subf %94, %97 : vector<8x8xf32>
    %99 = math.exp %98 : vector<8x8xf32>
    %cst_75 = arith.constant dense<0.000000e+00> : vector<8xf32>
    %100 = vector.multi_reduction <add>, %99, %cst_75 [1] : vector<8x8xf32> to vector<8xf32>
    %101 = vector.shape_cast %100 : vector<8xf32> to vector<8x1xf32>
    %102 = tpu.reciprocal %101 {approx = true} : vector<8x1xf32> -> vector<8x1xf32>
    %103 = vector.broadcast %102 : vector<8x1xf32> to vector<8x8xf32>
    %104 = arith.mulf %99, %103 : vector<8x8xf32>
    %c3 = arith.constant 3 : index
    %c0_76 = arith.constant 0 : index
    %c0_77 = arith.constant 0 : index
    %c0_78 = arith.constant 0 : index
    %105 = vector.load %arg26[%c3, %c0_76, %c0_77, %c0_78] : memref<4x1x8x8xf32, #tpu.memory_space<vmem>>, vector<1x1x8x8xf32>
    %106 = vector.shape_cast %105 : vector<1x1x8x8xf32> to vector<8x8xf32>
    %107 = vector.shape_cast %104 : vector<8x8xf32> to vector<1x1x8x8xf32>
    tpu.vector_store %arg26[%c3, %c0_76, %c0_77, %c0_78], %107 {strides = array<i32>} : memref<4x1x8x8xf32, #tpu.memory_space<vmem>>, vector<1x1x8x8xf32>,
    %108 = arith.truncf %104 : vector<8x8xf32> to vector<8x8xbf16>
    %c0_79 = arith.constant 0 : index
    %c24_80 = arith.constant 24 : index
    %109 = vector.load %arg30[%c0_79, %c24_80] : memref<16x32xbf16, #tpu.memory_space<vmem>>, vector<8x8xbf16>
    %cst_81 = arith.constant dense<0.000000e+00> : vector<8x8xf32>
    %110 = tpu.matmul %108, %109, %cst_81 {dimension_numbers = #tpu.dot_dimension_numbers<[1], [0], [0], [1], [0, 0, 1, 1], [], []>} : vector<8x8xbf16>, vector<8x8xbf16>, vector<8x8xf32> -> vector<8x8xf32>
    %c0_82 = arith.constant 0 : index
    %c24_83 = arith.constant 24 : index
    %111 = vector.load %arg31[%c0_82, %c24_83] : memref<8x32xf32, #tpu.memory_space<vmem>>, vector<8x8xf32>
    tpu.vector_store %arg31[%c0_82, %c24_83], %110 {strides = array<i32>} : memref<8x32xf32, #tpu.memory_space<vmem>>, vector<8x8xf32>,
    %c0_84 = arith.constant 0 : index
    %c0_85 = arith.constant 0 : index
    %112 = vector.load %arg31[%c0_84, %c0_85] : memref<8x32xf32, #tpu.memory_space<vmem>>, vector<8x32xf32>
    %113 = arith.addf %112, %1 : vector<8x32xf32>
    %c0_86 = arith.constant 0 : index
    %c0_87 = arith.constant 0 : index
    %114 = vector.load %arg9[%c0_86, %c0_87] : memref<1x32xf32, #tpu.memory_space<vmem>>, vector<1x32xf32>
    %c0_88 = arith.constant 0 : index
    %c0_89 = arith.constant 0 : index
    %115 = vector.load %arg10[%c0_88, %c0_89] : memref<1x32xf32, #tpu.memory_space<vmem>>, vector<1x32xf32>
    %cst_90 = arith.constant dense<0.000000e+00> : vector<8xf32>
    %116 = vector.multi_reduction <add>, %113, %cst_90 [1] : vector<8x32xf32> to vector<8xf32>
    %117 = vector.shape_cast %116 : vector<8xf32> to vector<8x1xf32>
    %cst_91 = arith.constant 3.200000e+01 : f32
    %118 = vector.broadcast %cst_91 : f32 to vector<8x1xf32>
    %119 = arith.divf %117, %118 : vector<8x1xf32>
    %120 = vector.broadcast %119 : vector<8x1xf32> to vector<8x32xf32>
    %121 = arith.subf %113, %120 : vector<8x32xf32>
    %122 = arith.mulf %121, %121 : vector<8x32xf32>
    %cst_92 = arith.constant dense<0.000000e+00> : vector<8xf32>
    %123 = vector.multi_reduction <add>, %122, %cst_92 [1] : vector<8x32xf32> to vector<8xf32>
    %124 = vector.shape_cast %123 : vector<8xf32> to vector<8x1xf32>
    %cst_93 = arith.constant 3.200000e+01 : f32
    %125 = vector.broadcast %cst_93 : f32 to vector<8x1xf32>
    %126 = arith.divf %124, %125 : vector<8x1xf32>
    %127 = vector.broadcast %119 : vector<8x1xf32> to vector<8x32xf32>
    %128 = arith.subf %113, %127 : vector<8x32xf32>
    %cst_94 = arith.constant 9.99999974E-6 : f32
    %129 = vector.broadcast %cst_94 : f32 to vector<8x1xf32>
    %130 = arith.addf %126, %129 : vector<8x1xf32>
    %131 = math.rsqrt %130 : vector<8x1xf32>
    %132 = vector.broadcast %131 : vector<8x1xf32> to vector<8x32xf32>
    %133 = arith.mulf %128, %132 : vector<8x32xf32>
    %134 = vector.broadcast %114 : vector<1x32xf32> to vector<8x32xf32>
    %135 = arith.mulf %133, %134 : vector<8x32xf32>
    %136 = vector.broadcast %115 : vector<1x32xf32> to vector<8x32xf32>
    %137 = arith.addf %135, %136 : vector<8x32xf32>
    %c0_95 = arith.constant 0 : index
    %c0_96 = arith.constant 0 : index
    %c0_97 = arith.constant 0 : index
    %138 = vector.load %arg2[%c0_95, %c0_96, %c0_97] : memref<1x16x32xf32, #tpu.memory_space<vmem>>, vector<1x16x32xf32>
    %139 = vector.shape_cast %138 : vector<1x16x32xf32> to vector<16x32xf32>
    %140 = arith.truncf %139 : vector<16x32xf32> to vector<16x32xbf16>
    %141 = arith.truncf %137 : vector<8x32xf32> to vector<8x32xbf16>
    %c0_98 = arith.constant 0 : index
    %c0_99 = arith.constant 0 : index
    %142 = vector.load %arg11[%c0_98, %c0_99] : memref<32x32xbf16, #tpu.memory_space<vmem>>, vector<32x32xbf16>
    %cst_100 = arith.constant dense<0.000000e+00> : vector<8x32xf32>
    %143 = tpu.matmul %141, %142, %cst_100 {dimension_numbers = #tpu.dot_dimension_numbers<[1], [0], [0], [1], [0, 0, 1, 1], [], []>} : vector<8x32xbf16>, vector<32x32xbf16>, vector<8x32xf32> -> vector<8x32xf32>
    %c0_101 = arith.constant 0 : index
    %c0_102 = arith.constant 0 : index
    %144 = vector.load %arg12[%c0_101, %c0_102] : memref<1x32xf32, #tpu.memory_space<vmem>>, vector<1x32xf32>
    %145 = vector.broadcast %144 : vector<1x32xf32> to vector<8x32xf32>
    %146 = arith.addf %143, %145 : vector<8x32xf32>
    %147 = arith.truncf %146 : vector<8x32xf32> to vector<8x32xbf16>
    %c0_103 = arith.constant 0 : index
    %c0_104 = arith.constant 0 : index
    %148 = vector.load %arg28[%c0_103, %c0_104] : memref<8x32xbf16, #tpu.memory_space<vmem>>, vector<8x32xbf16>
    tpu.vector_store %arg28[%c0_103, %c0_104], %147 {strides = array<i32>} : memref<8x32xbf16, #tpu.memory_space<vmem>>, vector<8x32xbf16>,
    %c0_105 = arith.constant 0 : index
    %c0_106 = arith.constant 0 : index
    %149 = vector.load %arg13[%c0_105, %c0_106] : memref<32x32xbf16, #tpu.memory_space<vmem>>, vector<32x32xbf16>
    %cst_107 = arith.constant dense<0.000000e+00> : vector<16x32xf32>
    %150 = tpu.matmul %140, %149, %cst_107 {dimension_numbers = #tpu.dot_dimension_numbers<[1], [0], [0], [1], [0, 0, 1, 1], [], []>} : vector<16x32xbf16>, vector<32x32xbf16>, vector<16x32xf32> -> vector<16x32xf32>
    %c0_108 = arith.constant 0 : index
    %c0_109 = arith.constant 0 : index
    %151 = vector.load %arg14[%c0_108, %c0_109] : memref<1x32xf32, #tpu.memory_space<vmem>>, vector<1x32xf32>
    %152 = vector.broadcast %151 : vector<1x32xf32> to vector<16x32xf32>
    %153 = arith.addf %150, %152 : vector<16x32xf32>
    %154 = arith.truncf %153 : vector<16x32xf32> to vector<16x32xbf16>
    %c0_110 = arith.constant 0 : index
    %c0_111 = arith.constant 0 : index
    %155 = vector.load %arg29[%c0_110, %c0_111] : memref<16x32xbf16, #tpu.memory_space<vmem>>, vector<16x32xbf16>
    tpu.vector_store %arg29[%c0_110, %c0_111], %154 {strides = array<i32>} : memref<16x32xbf16, #tpu.memory_space<vmem>>, vector<16x32xbf16>,
    %c0_112 = arith.constant 0 : index
    %c0_113 = arith.constant 0 : index
    %156 = vector.load %arg15[%c0_112, %c0_113] : memref<32x32xbf16, #tpu.memory_space<vmem>>, vector<32x32xbf16>
    %cst_114 = arith.constant dense<0.000000e+00> : vector<16x32xf32>
    %157 = tpu.matmul %140, %156, %cst_114 {dimension_numbers = #tpu.dot_dimension_numbers<[1], [0], [0], [1], [0, 0, 1, 1], [], []>} : vector<16x32xbf16>, vector<32x32xbf16>, vector<16x32xf32> -> vector<16x32xf32>
    %c0_115 = arith.constant 0 : index
    %c0_116 = arith.constant 0 : index
    %158 = vector.load %arg16[%c0_115, %c0_116] : memref<1x32xf32, #tpu.memory_space<vmem>>, vector<1x32xf32>
    %159 = vector.broadcast %158 : vector<1x32xf32> to vector<16x32xf32>
    %160 = arith.addf %157, %159 : vector<16x32xf32>
    %161 = arith.truncf %160 : vector<16x32xf32> to vector<16x32xbf16>
    %c0_117 = arith.constant 0 : index
    %c0_118 = arith.constant 0 : index
    %162 = vector.load %arg30[%c0_117, %c0_118] : memref<16x32xbf16, #tpu.memory_space<vmem>>, vector<16x32xbf16>
    tpu.vector_store %arg30[%c0_117, %c0_118], %161 {strides = array<i32>} : memref<16x32xbf16, #tpu.memory_space<vmem>>, vector<16x32xbf16>,
    %c0_119 = arith.constant 0 : index
    %c0_120 = arith.constant 0 : index
    %163 = vector.load %arg28[%c0_119, %c0_120] : memref<8x32xbf16, #tpu.memory_space<vmem>>, vector<8x8xbf16>
    %c0_121 = arith.constant 0 : index
    %c0_122 = arith.constant 0 : index
    %164 = vector.load %arg29[%c0_121, %c0_122] : memref<16x32xbf16, #tpu.memory_space<vmem>>, vector<16x8xbf16>
    %cst_123 = arith.constant dense<0.000000e+00> : vector<8x16xf32>
    %165 = tpu.matmul %163, %164, %cst_123 {dimension_numbers = #tpu.dot_dimension_numbers<[1], [1], [0], [0], [0, 0, 1, 0], [], []>} : vector<8x8xbf16>, vector<16x8xbf16>, vector<8x16xf32> -> vector<8x16xf32>
    %cst_124 = arith.constant 0.353553385 : f32
    %166 = vector.broadcast %cst_124 : f32 to vector<8x16xf32>
    %167 = arith.mulf %165, %166 : vector<8x16xf32>
    %cst_125 = arith.constant dense<0xFF800000> : vector<8xf32>
    %168 = vector.multi_reduction <maximumf>, %167, %cst_125 [1] : vector<8x16xf32> to vector<8xf32>
    %169 = vector.shape_cast %168 : vector<8xf32> to vector<8x1xf32>
    %170 = vector.broadcast %169 : vector<8x1xf32> to vector<8x16xf32>
    %171 = arith.subf %167, %170 : vector<8x16xf32>
    %172 = math.exp %171 : vector<8x16xf32>
    %cst_126 = arith.constant dense<0.000000e+00> : vector<8xf32>
    %173 = vector.multi_reduction <add>, %172, %cst_126 [1] : vector<8x16xf32> to vector<8xf32>
    %174 = vector.shape_cast %173 : vector<8xf32> to vector<8x1xf32>
    %175 = tpu.reciprocal %174 {approx = true} : vector<8x1xf32> -> vector<8x1xf32>
    %176 = vector.broadcast %175 : vector<8x1xf32> to vector<8x16xf32>
    %177 = arith.mulf %172, %176 : vector<8x16xf32>
    %c0_127 = arith.constant 0 : index
    %c0_128 = arith.constant 0 : index
    %c0_129 = arith.constant 0 : index
    %c0_130 = arith.constant 0 : index
    %178 = vector.load %arg27[%c0_127, %c0_128, %c0_129, %c0_130] : memref<4x1x8x16xf32, #tpu.memory_space<vmem>>, vector<1x1x8x16xf32>
    %179 = vector.shape_cast %178 : vector<1x1x8x16xf32> to vector<8x16xf32>
    %180 = vector.shape_cast %177 : vector<8x16xf32> to vector<1x1x8x16xf32>
    tpu.vector_store %arg27[%c0_127, %c0_128, %c0_129, %c0_130], %180 {strides = array<i32>} : memref<4x1x8x16xf32, #tpu.memory_space<vmem>>, vector<1x1x8x16xf32>,
    %181 = arith.truncf %177 : vector<8x16xf32> to vector<8x16xbf16>
    %c0_131 = arith.constant 0 : index
    %c0_132 = arith.constant 0 : index
    %182 = vector.load %arg30[%c0_131, %c0_132] : memref<16x32xbf16, #tpu.memory_space<vmem>>, vector<16x8xbf16>
    %cst_133 = arith.constant dense<0.000000e+00> : vector<8x8xf32>
    %183 = tpu.matmul %181, %182, %cst_133 {dimension_numbers = #tpu.dot_dimension_numbers<[1], [0], [0], [1], [0, 0, 1, 1], [], []>} : vector<8x16xbf16>, vector<16x8xbf16>, vector<8x8xf32> -> vector<8x8xf32>
    %c0_134 = arith.constant 0 : index
    %c0_135 = arith.constant 0 : index
    %184 = vector.load %arg31[%c0_134, %c0_135] : memref<8x32xf32, #tpu.memory_space<vmem>>, vector<8x8xf32>
    tpu.vector_store %arg31[%c0_134, %c0_135], %183 {strides = array<i32>} : memref<8x32xf32, #tpu.memory_space<vmem>>, vector<8x8xf32>,
    %c0_136 = arith.constant 0 : index
    %c8_137 = arith.constant 8 : index
    %185 = vector.load %arg28[%c0_136, %c8_137] : memref<8x32xbf16, #tpu.memory_space<vmem>>, vector<8x8xbf16>
    %c0_138 = arith.constant 0 : index
    %c8_139 = arith.constant 8 : index
    %186 = vector.load %arg29[%c0_138, %c8_139] : memref<16x32xbf16, #tpu.memory_space<vmem>>, vector<16x8xbf16>
    %cst_140 = arith.constant dense<0.000000e+00> : vector<8x16xf32>
    %187 = tpu.matmul %185, %186, %cst_140 {dimension_numbers = #tpu.dot_dimension_numbers<[1], [1], [0], [0], [0, 0, 1, 0], [], []>} : vector<8x8xbf16>, vector<16x8xbf16>, vector<8x16xf32> -> vector<8x16xf32>
    %cst_141 = arith.constant 0.353553385 : f32
    %188 = vector.broadcast %cst_141 : f32 to vector<8x16xf32>
    %189 = arith.mulf %187, %188 : vector<8x16xf32>
    %cst_142 = arith.constant dense<0xFF800000> : vector<8xf32>
    %190 = vector.multi_reduction <maximumf>, %189, %cst_142 [1] : vector<8x16xf32> to vector<8xf32>
    %191 = vector.shape_cast %190 : vector<8xf32> to vector<8x1xf32>
    %192 = vector.broadcast %191 : vector<8x1xf32> to vector<8x16xf32>
    %193 = arith.subf %189, %192 : vector<8x16xf32>
    %194 = math.exp %193 : vector<8x16xf32>
    %cst_143 = arith.constant dense<0.000000e+00> : vector<8xf32>
    %195 = vector.multi_reduction <add>, %194, %cst_143 [1] : vector<8x16xf32> to vector<8xf32>
    %196 = vector.shape_cast %195 : vector<8xf32> to vector<8x1xf32>
    %197 = tpu.reciprocal %196 {approx = true} : vector<8x1xf32> -> vector<8x1xf32>
    %198 = vector.broadcast %197 : vector<8x1xf32> to vector<8x16xf32>
    %199 = arith.mulf %194, %198 : vector<8x16xf32>
    %c1_144 = arith.constant 1 : index
    %c0_145 = arith.constant 0 : index
    %c0_146 = arith.constant 0 : index
    %c0_147 = arith.constant 0 : index
    %200 = vector.load %arg27[%c1_144, %c0_145, %c0_146, %c0_147] : memref<4x1x8x16xf32, #tpu.memory_space<vmem>>, vector<1x1x8x16xf32>
    %201 = vector.shape_cast %200 : vector<1x1x8x16xf32> to vector<8x16xf32>
    %202 = vector.shape_cast %199 : vector<8x16xf32> to vector<1x1x8x16xf32>
    tpu.vector_store %arg27[%c1_144, %c0_145, %c0_146, %c0_147], %202 {strides = array<i32>} : memref<4x1x8x16xf32, #tpu.memory_space<vmem>>, vector<1x1x8x16xf32>,
    %203 = arith.truncf %199 : vector<8x16xf32> to vector<8x16xbf16>
    %c0_148 = arith.constant 0 : index
    %c8_149 = arith.constant 8 : index
    %204 = vector.load %arg30[%c0_148, %c8_149] : memref<16x32xbf16, #tpu.memory_space<vmem>>, vector<16x8xbf16>
    %cst_150 = arith.constant dense<0.000000e+00> : vector<8x8xf32>
    %205 = tpu.matmul %203, %204, %cst_150 {dimension_numbers = #tpu.dot_dimension_numbers<[1], [0], [0], [1], [0, 0, 1, 1], [], []>} : vector<8x16xbf16>, vector<16x8xbf16>, vector<8x8xf32> -> vector<8x8xf32>
    %c0_151 = arith.constant 0 : index
    %c8_152 = arith.constant 8 : index
    %206 = vector.load %arg31[%c0_151, %c8_152] : memref<8x32xf32, #tpu.memory_space<vmem>>, vector<8x8xf32>
    tpu.vector_store %arg31[%c0_151, %c8_152], %205 {strides = array<i32>} : memref<8x32xf32, #tpu.memory_space<vmem>>, vector<8x8xf32>,
    %c0_153 = arith.constant 0 : index
    %c16_154 = arith.constant 16 : index
    %207 = vector.load %arg28[%c0_153, %c16_154] : memref<8x32xbf16, #tpu.memory_space<vmem>>, vector<8x8xbf16>
    %c0_155 = arith.constant 0 : index
    %c16_156 = arith.constant 16 : index
    %208 = vector.load %arg29[%c0_155, %c16_156] : memref<16x32xbf16, #tpu.memory_space<vmem>>, vector<16x8xbf16>
    %cst_157 = arith.constant dense<0.000000e+00> : vector<8x16xf32>
    %209 = tpu.matmul %207, %208, %cst_157 {dimension_numbers = #tpu.dot_dimension_numbers<[1], [1], [0], [0], [0, 0, 1, 0], [], []>} : vector<8x8xbf16>, vector<16x8xbf16>, vector<8x16xf32> -> vector<8x16xf32>
    %cst_158 = arith.constant 0.353553385 : f32
    %210 = vector.broadcast %cst_158 : f32 to vector<8x16xf32>
    %211 = arith.mulf %209, %210 : vector<8x16xf32>
    %cst_159 = arith.constant dense<0xFF800000> : vector<8xf32>
    %212 = vector.multi_reduction <maximumf>, %211, %cst_159 [1] : vector<8x16xf32> to vector<8xf32>
    %213 = vector.shape_cast %212 : vector<8xf32> to vector<8x1xf32>
    %214 = vector.broadcast %213 : vector<8x1xf32> to vector<8x16xf32>
    %215 = arith.subf %211, %214 : vector<8x16xf32>
    %216 = math.exp %215 : vector<8x16xf32>
    %cst_160 = arith.constant dense<0.000000e+00> : vector<8xf32>
    %217 = vector.multi_reduction <add>, %216, %cst_160 [1] : vector<8x16xf32> to vector<8xf32>
    %218 = vector.shape_cast %217 : vector<8xf32> to vector<8x1xf32>
    %219 = tpu.reciprocal %218 {approx = true} : vector<8x1xf32> -> vector<8x1xf32>
    %220 = vector.broadcast %219 : vector<8x1xf32> to vector<8x16xf32>
    %221 = arith.mulf %216, %220 : vector<8x16xf32>
    %c2_161 = arith.constant 2 : index
    %c0_162 = arith.constant 0 : index
    %c0_163 = arith.constant 0 : index
    %c0_164 = arith.constant 0 : index
    %222 = vector.load %arg27[%c2_161, %c0_162, %c0_163, %c0_164] : memref<4x1x8x16xf32, #tpu.memory_space<vmem>>, vector<1x1x8x16xf32>
    %223 = vector.shape_cast %222 : vector<1x1x8x16xf32> to vector<8x16xf32>
    %224 = vector.shape_cast %221 : vector<8x16xf32> to vector<1x1x8x16xf32>
    tpu.vector_store %arg27[%c2_161, %c0_162, %c0_163, %c0_164], %224 {strides = array<i32>} : memref<4x1x8x16xf32, #tpu.memory_space<vmem>>, vector<1x1x8x16xf32>,
    %225 = arith.truncf %221 : vector<8x16xf32> to vector<8x16xbf16>
    %c0_165 = arith.constant 0 : index
    %c16_166 = arith.constant 16 : index
    %226 = vector.load %arg30[%c0_165, %c16_166] : memref<16x32xbf16, #tpu.memory_space<vmem>>, vector<16x8xbf16>
    %cst_167 = arith.constant dense<0.000000e+00> : vector<8x8xf32>
    %227 = tpu.matmul %225, %226, %cst_167 {dimension_numbers = #tpu.dot_dimension_numbers<[1], [0], [0], [1], [0, 0, 1, 1], [], []>} : vector<8x16xbf16>, vector<16x8xbf16>, vector<8x8xf32> -> vector<8x8xf32>
    %c0_168 = arith.constant 0 : index
    %c16_169 = arith.constant 16 : index
    %228 = vector.load %arg31[%c0_168, %c16_169] : memref<8x32xf32, #tpu.memory_space<vmem>>, vector<8x8xf32>
    tpu.vector_store %arg31[%c0_168, %c16_169], %227 {strides = array<i32>} : memref<8x32xf32, #tpu.memory_space<vmem>>, vector<8x8xf32>,
    %c0_170 = arith.constant 0 : index
    %c24_171 = arith.constant 24 : index
    %229 = vector.load %arg28[%c0_170, %c24_171] : memref<8x32xbf16, #tpu.memory_space<vmem>>, vector<8x8xbf16>
    %c0_172 = arith.constant 0 : index
    %c24_173 = arith.constant 24 : index
    %230 = vector.load %arg29[%c0_172, %c24_173] : memref<16x32xbf16, #tpu.memory_space<vmem>>, vector<16x8xbf16>
    %cst_174 = arith.constant dense<0.000000e+00> : vector<8x16xf32>
    %231 = tpu.matmul %229, %230, %cst_174 {dimension_numbers = #tpu.dot_dimension_numbers<[1], [1], [0], [0], [0, 0, 1, 0], [], []>} : vector<8x8xbf16>, vector<16x8xbf16>, vector<8x16xf32> -> vector<8x16xf32>
    %cst_175 = arith.constant 0.353553385 : f32
    %232 = vector.broadcast %cst_175 : f32 to vector<8x16xf32>
    %233 = arith.mulf %231, %232 : vector<8x16xf32>
    %cst_176 = arith.constant dense<0xFF800000> : vector<8xf32>
    %234 = vector.multi_reduction <maximumf>, %233, %cst_176 [1] : vector<8x16xf32> to vector<8xf32>
    %235 = vector.shape_cast %234 : vector<8xf32> to vector<8x1xf32>
    %236 = vector.broadcast %235 : vector<8x1xf32> to vector<8x16xf32>
    %237 = arith.subf %233, %236 : vector<8x16xf32>
    %238 = math.exp %237 : vector<8x16xf32>
    %cst_177 = arith.constant dense<0.000000e+00> : vector<8xf32>
    %239 = vector.multi_reduction <add>, %238, %cst_177 [1] : vector<8x16xf32> to vector<8xf32>
    %240 = vector.shape_cast %239 : vector<8xf32> to vector<8x1xf32>
    %241 = tpu.reciprocal %240 {approx = true} : vector<8x1xf32> -> vector<8x1xf32>
    %242 = vector.broadcast %241 : vector<8x1xf32> to vector<8x16xf32>
    %243 = arith.mulf %238, %242 : vector<8x16xf32>
    %c3_178 = arith.constant 3 : index
    %c0_179 = arith.constant 0 : index
    %c0_180 = arith.constant 0 : index
    %c0_181 = arith.constant 0 : index
    %244 = vector.load %arg27[%c3_178, %c0_179, %c0_180, %c0_181] : memref<4x1x8x16xf32, #tpu.memory_space<vmem>>, vector<1x1x8x16xf32>
    %245 = vector.shape_cast %244 : vector<1x1x8x16xf32> to vector<8x16xf32>
    %246 = vector.shape_cast %243 : vector<8x16xf32> to vector<1x1x8x16xf32>
    tpu.vector_store %arg27[%c3_178, %c0_179, %c0_180, %c0_181], %246 {strides = array<i32>} : memref<4x1x8x16xf32, #tpu.memory_space<vmem>>, vector<1x1x8x16xf32>,
    %247 = arith.truncf %243 : vector<8x16xf32> to vector<8x16xbf16>
    %c0_182 = arith.constant 0 : index
    %c24_183 = arith.constant 24 : index
    %248 = vector.load %arg30[%c0_182, %c24_183] : memref<16x32xbf16, #tpu.memory_space<vmem>>, vector<16x8xbf16>
    %cst_184 = arith.constant dense<0.000000e+00> : vector<8x8xf32>
    %249 = tpu.matmul %247, %248, %cst_184 {dimension_numbers = #tpu.dot_dimension_numbers<[1], [0], [0], [1], [0, 0, 1, 1], [], []>} : vector<8x16xbf16>, vector<16x8xbf16>, vector<8x8xf32> -> vector<8x8xf32>
    %c0_185 = arith.constant 0 : index
    %c24_186 = arith.constant 24 : index
    %250 = vector.load %arg31[%c0_185, %c24_186] : memref<8x32xf32, #tpu.memory_space<vmem>>, vector<8x8xf32>
    tpu.vector_store %arg31[%c0_185, %c24_186], %249 {strides = array<i32>} : memref<8x32xf32, #tpu.memory_space<vmem>>, vector<8x8xf32>,
    %c0_187 = arith.constant 0 : index
    %c0_188 = arith.constant 0 : index
    %251 = vector.load %arg31[%c0_187, %c0_188] : memref<8x32xf32, #tpu.memory_space<vmem>>, vector<8x32xf32>
    %252 = arith.addf %251, %137 : vector<8x32xf32>
    %c0_189 = arith.constant 0 : index
    %c0_190 = arith.constant 0 : index
    %253 = vector.load %arg17[%c0_189, %c0_190] : memref<1x32xf32, #tpu.memory_space<vmem>>, vector<1x32xf32>
    %c0_191 = arith.constant 0 : index
    %c0_192 = arith.constant 0 : index
    %254 = vector.load %arg18[%c0_191, %c0_192] : memref<1x32xf32, #tpu.memory_space<vmem>>, vector<1x32xf32>
    %cst_193 = arith.constant dense<0.000000e+00> : vector<8xf32>
    %255 = vector.multi_reduction <add>, %252, %cst_193 [1] : vector<8x32xf32> to vector<8xf32>
    %256 = vector.shape_cast %255 : vector<8xf32> to vector<8x1xf32>
    %cst_194 = arith.constant 3.200000e+01 : f32
    %257 = vector.broadcast %cst_194 : f32 to vector<8x1xf32>
    %258 = arith.divf %256, %257 : vector<8x1xf32>
    %259 = vector.broadcast %258 : vector<8x1xf32> to vector<8x32xf32>
    %260 = arith.subf %252, %259 : vector<8x32xf32>
    %261 = arith.mulf %260, %260 : vector<8x32xf32>
    %cst_195 = arith.constant dense<0.000000e+00> : vector<8xf32>
    %262 = vector.multi_reduction <add>, %261, %cst_195 [1] : vector<8x32xf32> to vector<8xf32>
    %263 = vector.shape_cast %262 : vector<8xf32> to vector<8x1xf32>
    %cst_196 = arith.constant 3.200000e+01 : f32
    %264 = vector.broadcast %cst_196 : f32 to vector<8x1xf32>
    %265 = arith.divf %263, %264 : vector<8x1xf32>
    %266 = vector.broadcast %258 : vector<8x1xf32> to vector<8x32xf32>
    %267 = arith.subf %252, %266 : vector<8x32xf32>
    %cst_197 = arith.constant 9.99999974E-6 : f32
    %268 = vector.broadcast %cst_197 : f32 to vector<8x1xf32>
    %269 = arith.addf %265, %268 : vector<8x1xf32>
    %270 = math.rsqrt %269 : vector<8x1xf32>
    %271 = vector.broadcast %270 : vector<8x1xf32> to vector<8x32xf32>
    %272 = arith.mulf %267, %271 : vector<8x32xf32>
    %273 = vector.broadcast %253 : vector<1x32xf32> to vector<8x32xf32>
    %274 = arith.mulf %272, %273 : vector<8x32xf32>
    %275 = vector.broadcast %254 : vector<1x32xf32> to vector<8x32xf32>
    %276 = arith.addf %274, %275 : vector<8x32xf32>
    %277 = arith.truncf %276 : vector<8x32xf32> to vector<8x32xbf16>
    %c0_198 = arith.constant 0 : index
    %c0_199 = arith.constant 0 : index
    %278 = vector.load %arg19[%c0_198, %c0_199] : memref<32x64xbf16, #tpu.memory_space<vmem>>, vector<32x64xbf16>
    %cst_200 = arith.constant dense<0.000000e+00> : vector<8x64xf32>
    %279 = tpu.matmul %277, %278, %cst_200 {dimension_numbers = #tpu.dot_dimension_numbers<[1], [0], [0], [1], [0, 0, 1, 1], [], []>} : vector<8x32xbf16>, vector<32x64xbf16>, vector<8x64xf32> -> vector<8x64xf32>
    %c0_201 = arith.constant 0 : index
    %c0_202 = arith.constant 0 : index
    %280 = vector.load %arg20[%c0_201, %c0_202] : memref<1x64xf32, #tpu.memory_space<vmem>>, vector<1x64xf32>
    %281 = vector.broadcast %280 : vector<1x64xf32> to vector<8x64xf32>
    %282 = arith.addf %279, %281 : vector<8x64xf32>
    %cst_203 = arith.constant 0.000000e+00 : f32
    %283 = vector.broadcast %cst_203 : f32 to vector<8x64xf32>
    %284 = arith.maximumf %282, %283 : vector<8x64xf32>
    %285 = arith.truncf %284 : vector<8x64xf32> to vector<8x64xbf16>
    %c0_204 = arith.constant 0 : index
    %c0_205 = arith.constant 0 : index
    %286 = vector.load %arg21[%c0_204, %c0_205] : memref<64x32xbf16, #tpu.memory_space<vmem>>, vector<64x32xbf16>
    %cst_206 = arith.constant dense<0.000000e+00> : vector<8x32xf32>
    %287 = tpu.matmul %285, %286, %cst_206 {dimension_numbers = #tpu.dot_dimension_numbers<[1], [0], [0], [1], [0, 0, 1, 1], [], []>} : vector<8x64xbf16>, vector<64x32xbf16>, vector<8x32xf32> -> vector<8x32xf32>
    %c0_207 = arith.constant 0 : index
    %c0_208 = arith.constant 0 : index
    %288 = vector.load %arg22[%c0_207, %c0_208] : memref<1x32xf32, #tpu.memory_space<vmem>>, vector<1x32xf32>
    %289 = vector.broadcast %288 : vector<1x32xf32> to vector<8x32xf32>
    %290 = arith.addf %287, %289 : vector<8x32xf32>
    %291 = arith.addf %290, %276 : vector<8x32xf32>
    %c0_209 = arith.constant 0 : index
    %c0_210 = arith.constant 0 : index
    %292 = vector.load %arg23[%c0_209, %c0_210] : memref<1x32xf32, #tpu.memory_space<vmem>>, vector<1x32xf32>
    %c0_211 = arith.constant 0 : index
    %c0_212 = arith.constant 0 : index
    %293 = vector.load %arg24[%c0_211, %c0_212] : memref<1x32xf32, #tpu.memory_space<vmem>>, vector<1x32xf32>
    %cst_213 = arith.constant dense<0.000000e+00> : vector<8xf32>
    %294 = vector.multi_reduction <add>, %291, %cst_213 [1] : vector<8x32xf32> to vector<8xf32>
    %295 = vector.shape_cast %294 : vector<8xf32> to vector<8x1xf32>
    %cst_214 = arith.constant 3.200000e+01 : f32
    %296 = vector.broadcast %cst_214 : f32 to vector<8x1xf32>
    %297 = arith.divf %295, %296 : vector<8x1xf32>
    %298 = vector.broadcast %297 : vector<8x1xf32> to vector<8x32xf32>
    %299 = arith.subf %291, %298 : vector<8x32xf32>
    %300 = arith.mulf %299, %299 : vector<8x32xf32>
    %cst_215 = arith.constant dense<0.000000e+00> : vector<8xf32>
    %301 = vector.multi_reduction <add>, %300, %cst_215 [1] : vector<8x32xf32> to vector<8xf32>
    %302 = vector.shape_cast %301 : vector<8xf32> to vector<8x1xf32>
    %cst_216 = arith.constant 3.200000e+01 : f32
    %303 = vector.broadcast %cst_216 : f32 to vector<8x1xf32>
    %304 = arith.divf %302, %303 : vector<8x1xf32>
    %305 = vector.broadcast %297 : vector<8x1xf32> to vector<8x32xf32>
    %306 = arith.subf %291, %305 : vector<8x32xf32>
    %cst_217 = arith.constant 9.99999974E-6 : f32
    %307 = vector.broadcast %cst_217 : f32 to vector<8x1xf32>
    %308 = arith.addf %304, %307 : vector<8x1xf32>
    %309 = math.rsqrt %308 : vector<8x1xf32>
    %310 = vector.broadcast %309 : vector<8x1xf32> to vector<8x32xf32>
    %311 = arith.mulf %306, %310 : vector<8x32xf32>
    %312 = vector.broadcast %292 : vector<1x32xf32> to vector<8x32xf32>
    %313 = arith.mulf %311, %312 : vector<8x32xf32>
    %314 = vector.broadcast %293 : vector<1x32xf32> to vector<8x32xf32>
    %315 = arith.addf %313, %314 : vector<8x32xf32>
    %c0_218 = arith.constant 0 : index
    %c0_219 = arith.constant 0 : index
    %c0_220 = arith.constant 0 : index
    %316 = vector.load %arg25[%c0_218, %c0_219, %c0_220] : memref<1x8x32xf32, #tpu.memory_space<vmem>>, vector<1x8x32xf32>
    %317 = vector.shape_cast %316 : vector<1x8x32xf32> to vector<8x32xf32>
    %318 = vector.shape_cast %315 : vector<8x32xf32> to vector<1x8x32xf32>
    tpu.vector_store %arg25[%c0_218, %c0_219, %c0_220], %318 {strides = array<i32>} : memref<1x8x32xf32, #tpu.memory_space<vmem>>, vector<1x8x32xf32>,
    return
  }
  func.func @transform_0(%arg0: i32) -> (i32, i32, i32) {
    %c0_i32 = arith.constant 0 : i32
    %c0_i32_0 = arith.constant 0 : i32
    %c0_i32_1 = arith.constant 0 : i32
    return %arg0, %c0_i32, %c0_i32_0 : i32, i32, i32
  }
  func.func @transform_1(%arg0: i32) -> (i32, i32, i32) {
    %c0_i32 = arith.constant 0 : i32
    %c0_i32_0 = arith.constant 0 : i32
    %c0_i32_1 = arith.constant 0 : i32
    return %arg0, %c0_i32, %c0_i32_0 : i32, i32, i32
  }
  func.func @transform_2(%arg0: i32) -> (i32, i32) {
    %c0_i32 = arith.constant 0 : i32
    %c0_i32_0 = arith.constant 0 : i32
    %c0_i32_1 = arith.constant 0 : i32
    return %c0_i32, %c0_i32_0 : i32, i32
  }
  func.func @transform_3(%arg0: i32) -> (i32, i32) {
    %c0_i32 = arith.constant 0 : i32
    %c0_i32_0 = arith.constant 0 : i32
    %c0_i32_1 = arith.constant 0 : i32
    return %c0_i32, %c0_i32_0 : i32, i32
  }
  func.func @transform_4(%arg0: i32) -> (i32, i32) {
    %c0_i32 = arith.constant 0 : i32
    %c0_i32_0 = arith.constant 0 : i32
    %c0_i32_1 = arith.constant 0 : i32
    return %c0_i32, %c0_i32_0 : i32, i32
  }
  func.func @transform_5(%arg0: i32) -> (i32, i32) {
    %c0_i32 = arith.constant 0 : i32
    %c0_i32_0 = arith.constant 0 : i32
    %c0_i32_1 = arith.constant 0 : i32
    return %c0_i32, %c0_i32_0 : i32, i32
  }
  func.func @transform_6(%arg0: i32) -> (i32, i32) {
    %c0_i32 = arith.constant 0 : i32
    %c0_i32_0 = arith.constant 0 : i32
    %c0_i32_1 = arith.constant 0 : i32
    return %c0_i32, %c0_i32_0 : i32, i32
  }
  func.func @transform_7(%arg0: i32) -> (i32, i32) {
    %c0_i32 = arith.constant 0 : i32
    %c0_i32_0 = arith.constant 0 : i32
    %c0_i32_1 = arith.constant 0 : i32
    return %c0_i32, %c0_i32_0 : i32, i32
  }
  func.func @transform_8(%arg0: i32) -> (i32, i32) {
    %c0_i32 = arith.constant 0 : i32
    %c0_i32_0 = arith.constant 0 : i32
    %c0_i32_1 = arith.constant 0 : i32
    return %c0_i32, %c0_i32_0 : i32, i32
  }
  func.func @transform_9(%arg0: i32) -> (i32, i32) {
    %c0_i32 = arith.constant 0 : i32
    %c0_i32_0 = arith.constant 0 : i32
    %c0_i32_1 = arith.constant 0 : i32
    return %c0_i32, %c0_i32_0 : i32, i32
  }
  func.func @transform_10(%arg0: i32) -> (i32, i32) {
    %c0_i32 = arith.constant 0 : i32
    %c0_i32_0 = arith.constant 0 : i32
    %c0_i32_1 = arith.constant 0 : i32
    return %c0_i32, %c0_i32_0 : i32, i32
  }
  func.func @transform_11(%arg0: i32) -> (i32, i32) {
    %c0_i32 = arith.constant 0 : i32
    %c0_i32_0 = arith.constant 0 : i32
    %c0_i32_1 = arith.constant 0 : i32
    return %c0_i32, %c0_i32_0 : i32, i32
  }
  func.func @transform_12(%arg0: i32) -> (i32, i32) {
    %c0_i32 = arith.constant 0 : i32
    %c0_i32_0 = arith.constant 0 : i32
    %c0_i32_1 = arith.constant 0 : i32
    return %c0_i32, %c0_i32_0 : i32, i32
  }
  func.func @transform_13(%arg0: i32) -> (i32, i32) {
    %c0_i32 = arith.constant 0 : i32
    %c0_i32_0 = arith.constant 0 : i32
    %c0_i32_1 = arith.constant 0 : i32
    return %c0_i32, %c0_i32_0 : i32, i32
  }
  func.func @transform_14(%arg0: i32) -> (i32, i32) {
    %c0_i32 = arith.constant 0 : i32
    %c0_i32_0 = arith.constant 0 : i32
    %c0_i32_1 = arith.constant 0 : i32
    return %c0_i32, %c0_i32_0 : i32, i32
  }
  func.func @transform_15(%arg0: i32) -> (i32, i32) {
    %c0_i32 = arith.constant 0 : i32
    %c0_i32_0 = arith.constant 0 : i32
    %c0_i32_1 = arith.constant 0 : i32
    return %c0_i32, %c0_i32_0 : i32, i32
  }
  func.func @transform_16(%arg0: i32) -> (i32, i32) {
    %c0_i32 = arith.constant 0 : i32
    %c0_i32_0 = arith.constant 0 : i32
    %c0_i32_1 = arith.constant 0 : i32
    return %c0_i32, %c0_i32_0 : i32, i32
  }
  func.func @transform_17(%arg0: i32) -> (i32, i32) {
    %c0_i32 = arith.constant 0 : i32
    %c0_i32_0 = arith.constant 0 : i32
    %c0_i32_1 = arith.constant 0 : i32
    return %c0_i32, %c0_i32_0 : i32, i32
  }
  func.func @transform_18(%arg0: i32) -> (i32, i32) {
    %c0_i32 = arith.constant 0 : i32
    %c0_i32_0 = arith.constant 0 : i32
    %c0_i32_1 = arith.constant 0 : i32
    return %c0_i32, %c0_i32_0 : i32, i32
  }
  func.func @transform_19(%arg0: i32) -> (i32, i32) {
    %c0_i32 = arith.constant 0 : i32
    %c0_i32_0 = arith.constant 0 : i32
    %c0_i32_1 = arith.constant 0 : i32
    return %c0_i32, %c0_i32_0 : i32, i32
  }
  func.func @transform_20(%arg0: i32) -> (i32, i32) {
    %c0_i32 = arith.constant 0 : i32
    %c0_i32_0 = arith.constant 0 : i32
    %c0_i32_1 = arith.constant 0 : i32
    return %c0_i32, %c0_i32_0 : i32, i32
  }
  func.func @transform_21(%arg0: i32) -> (i32, i32) {
    %c0_i32 = arith.constant 0 : i32
    %c0_i32_0 = arith.constant 0 : i32
    %c0_i32_1 = arith.constant 0 : i32
    return %c0_i32, %c0_i32_0 : i32, i32
  }
  func.func @transform_22(%arg0: i32) -> (i32, i32) {
    %c0_i32 = arith.constant 0 : i32
    %c0_i32_0 = arith.constant 0 : i32
    %c0_i32_1 = arith.constant 0 : i32
    return %c0_i32, %c0_i32_0 : i32, i32
  }
  func.func @transform_23(%arg0: i32) -> (i32, i32) {
    %c0_i32 = arith.constant 0 : i32
    %c0_i32_0 = arith.constant 0 : i32
    %c0_i32_1 = arith.constant 0 : i32
    return %c0_i32, %c0_i32_0 : i32, i32
  }
  func.func @transform_24(%arg0: i32) -> (i32, i32, i32) {
    %c0_i32 = arith.constant 0 : i32
    %c0_i32_0 = arith.constant 0 : i32
    %c0_i32_1 = arith.constant 0 : i32
    return %arg0, %c0_i32, %c0_i32_0 : i32, i32, i32
  }
  func.func @transform_25(%arg0: i32) -> (i32, i32, i32, i32) {
    %c0_i32 = arith.constant 0 : i32
    %c0_i32_0 = arith.constant 0 : i32
    %c0_i32_1 = arith.constant 0 : i32
    %c0_i32_2 = arith.constant 0 : i32
    return %c0_i32, %arg0, %c0_i32_0, %c0_i32_1 : i32, i32, i32, i32
  }
  func.func @transform_26(%arg0: i32) -> (i32, i32, i32, i32) {
    %c0_i32 = arith.constant 0 : i32
    %c0_i32_0 = arith.constant 0 : i32
    %c0_i32_1 = arith.constant 0 : i32
    %c0_i32_2 = arith.constant 0 : i32
    return %c0_i32, %arg0, %c0_i32_0, %c0_i32_1 : i32, i32, i32, i32
  }
}

</mosaic_0001>

<bundles_post_ra>
// kernel: speech_transformer_decoder_layer.1
= control target key start
LH: loop header
LB: loop body
LE: loop exit
PB: predicated region body
PF: predicated region fallthrough
CT: control target
= control target key end

     0   :  { %s4273_s0 = inlined_call_operand.vmem [shape: f32[2,8,32], index: 0, kind: input, shape index: {}]   ;;  %s4274_s1 = inlined_call_operand.vmem [shape: f32[2,16,32], index: 1, kind: input, shape index: {}]   ;;  %s4275_s2 = inlined_call_operand.vmem [shape: bf16[32,32], index: 2, kind: input, shape index: {}]   ;;  %s4276_s3 = inlined_call_operand.vmem [shape: f32[1,32], index: 3, kind: input, shape index: {}]   ;;  %s4277_s4 = inlined_call_operand.hbm [shape: bf16[32,32], index: 4, kind: input, shape index: {}]   ;;  %s4278_s5 = inlined_call_operand.hbm [shape: f32[1,32], index: 5, kind: input, shape index: {}]   ;;  %s4279_s6 = inlined_call_operand.hbm [shape: bf16[32,32], index: 6, kind: input, shape index: {}]   ;;  %s4280_s7 = inlined_call_operand.vmem [shape: f32[1,32], index: 7, kind: input, shape index: {}]   ;;  %s4281_s8 = inlined_call_operand.vmem [shape: f32[1,32], index: 8, kind: input, shape index: {}]   ;;  %s4282_s9 = inlined_call_operand.hbm [shape: f32[1,32], index: 9, kind: input, shape index: {}]   ;;  %s4283_s10 = inlined_call_operand.hbm [shape: bf16[32,32], index: 10, kind: input, shape index: {}]   ;;  %s4284_s11 = inlined_call_operand.hbm [shape: f32[1,32], index: 11, kind: input, shape index: {}]   ;;  %s4285_s12 = inlined_call_operand.hbm [shape: bf16[32,32], index: 12, kind: input, shape index: {}]   ;;  %s4286_s13 = inlined_call_operand.hbm [shape: f32[1,32], index: 13, kind: input, shape index: {}]   ;;  %s4287_s14 = inlined_call_operand.hbm [shape: bf16[32,32], index: 14, kind: input, shape index: {}]   ;;  %s4288_s15 = inlined_call_operand.hbm [shape: f32[1,32], index: 15, kind: input, shape index: {}]   ;;  %s4289_s16 = inlined_call_operand.hbm [shape: f32[1,32], index: 16, kind: input, shape index: {}]   ;;  %s4290_s17 = inlined_call_operand.hbm [shape: f32[1,32], index: 17, kind: input, shape index: {}]   ;;  %s4291_s18 = inlined_call_operand.hbm [shape: bf16[32,64], index: 18, kind: input, shape index: {}]   ;;  %s4292_s19 = inlined_call_operand.hbm [shape: f32[1,64], index: 19, kind: input, shape index: {}]   ;;  %s4293_s20 = inlined_call_operand.vmem [shape: bf16[64,32], index: 20, kind: input, shape index: {}]   ;;  %s4294_s21 = inlined_call_operand.hbm [shape: f32[1,32], index: 21, kind: input, shape index: {}]   ;;  %s4295_s22 = inlined_call_operand.hbm [shape: f32[1,32], index: 22, kind: input, shape index: {}]   ;;  %s4296_s23 = inlined_call_operand.hbm [shape: f32[1,32], index: 23, kind: input, shape index: {}]   ;;  %s4297_s24 = inlined_call_operand.hbm [shape: f32[2,8,32], index: 24, kind: output, shape index: {0}]   ;;  %s4298_s25 = inlined_call_operand.hbm [shape: f32[4,2,8,8], index: 25, kind: output, shape index: {1}]   ;;  %s4299_s26 = inlined_call_operand.hbm [shape: f32[4,2,8,16], index: 26, kind: output, shape index: {2}]  }
   0x1   :  { %4314 = sst [smem:[#allocation54_spill]] %s4273_s0 }
   0x2   :  { %4315 = sst [smem:[#allocation55_spill]] %s4274_s1 }
   0x3   :  { %4316 = sst [smem:[#allocation56_spill]] %s4275_s2 }
   0x4   :  { %4317 = sst [smem:[#allocation57_spill]] %s4276_s3 }
   0x5   :  { %4318 = sst [smem:[#allocation58_spill]] %s4277_s4 }
   0x6   :  { %4319 = sst [smem:[#allocation59_spill]] %s4278_s5 }
   0x7   :  { %4320 = sst [smem:[#allocation60_spill]] %s4279_s6 }
   0x8   :  { %4321 = sst [smem:[#allocation61_spill]] %s4280_s7 }
   0x9   :  { %4322 = sst [smem:[#allocation62_spill]] %s4281_s8 }
   0xa   :  { %4323 = sst [smem:[#allocation63_spill]] %s4282_s9 }
   0xb   :  { %4324 = sst [smem:[#allocation64_spill]] %s4283_s10 }
   0xc   :  { %4325 = sst [smem:[#allocation65_spill]] %s4284_s11 }
   0xd   :  { %4326 = sst [smem:[#allocation66_spill]] %s4285_s12 }
   0xe   :  { %4327 = sst [smem:[#allocation67_spill]] %s4286_s13 }
   0xf   :  { %4328 = sst [smem:[#allocation68_spill]] %s4287_s14 }
  0x10   :  { %4329 = sst [smem:[#allocation69_spill]] %s4288_s15 }
  0x11   :  { %4330 = sst [smem:[#allocation70_spill]] %s4289_s16 }
  0x12   :  { %4331 = sst [smem:[#allocation71_spill]] %s4297_s24 }
  0x13   :  { %4332 = sst [smem:[#allocation72_spill]] %s4298_s25 }
  0x14   :  { %4333 = sst [smem:[#allocation73_spill]] %s4299_s26 }
  0x15   :  { %32 = vsyncpa [#allocation7], 0 }
  0x16   :  { %33 = vsyncpa [#allocation10], 0 }
  0x17   :  { %34 = vsyncpa [#allocation13], 0 }
  0x18   :  { %35 = vsyncpa [#allocation16], 0 }
  0x19   :  { %36 = vsyncpa [#allocation19], 0 }
  0x1a   :  { %37 = vsyncpa [#allocation22], 0 }
  0x1b   :  { %38 = vsyncpa [#allocation25], 0 }
  0x1c   :  { %39 = vsyncpa [#allocation28], 0 }
  0x1d   :  { %40 = vsyncpa [#allocation31], 0 }
  0x1e   :  { %41 = vsyncpa [#allocation8], 0 }
  0x1f   :  { %43 = vsyncpa [#allocation8 + $0x1], 0 }
  0x20   :  { %44 = vsyncpa [#allocation35], 0 }
  0x21   :  { %46 = vsyncpa [#allocation35 + $0x1], 0  ;;  %s3802_s27 = smov 0   ;;  %s3804_s3 = smov 0  }
  0x22   :  { %s3806_s7 = smov 0   ;;  %s3808_s28 = smov 0  }
  0x23 LB: > { %4334 = sst [smem:[#allocation48_spill]] %s3625_s27  ;;  %s3823_s8 = sadd.s32 4294967295, %s3637_s28   ;;  %s3637_s28 = sphi %s3808_s28, %s4369_s28   ;;  %s3633_s7 = sphi %s3806_s7, %s4371_s7   ;;  %s3629_s3 = sphi %s3804_s3, %s4373_s3   ;;  %s3625_s27 = sphi %s3802_s27, %s4372_s27  }
  0x24   : > { %4335 = sst [smem:[#allocation49_spill]] %s3633_s7  ;;  %s4301_s4 = sadd.s32 4294967294, %s3637_s28  }
  0x25   : > { %4336 = sst [smem:[#allocation50_spill]] %s3637_s28  ;;  %s3827_s29 = sadd.s32 1, %s3637_s28  }
  0x26   : > { %4337 = sst [smem:[#allocation51_spill]] %s3827_s29  ;;  %s573_s0 = sadd.s32 1, %s3633_s7 }
  0x27   : > { %s570_s9 = ssub.s32 %s3637_s28, %s3827_s29  ;;  %p583_p0 = scmp.ne.s32.totalorder %s3633_s7, %s3629_s3 }
  0x28   : > { %p571_p1 = scmp.eq.s32.totalorder %s570_s9, 0  ;;  %p584_p2 = scmp.eq.s32.totalorder %s3823_s8, 1 }
  0x29   : > { %p589_p3 = scmp.ne.s32.totalorder %s3629_s3, %s3625_s27  ;;  %p590_p4 = scmp.eq.s32.totalorder %s4301_s4, 1 }
  0x2a   : > { %s3840_s30 = scalar_select %p571_p1, %s3633_s7, %s573_s0  }
  0x2b   : > { %p3842_p5 = por %p584_p2, %p583_p0  ;;  %p3846_p6 = por %p590_p4, %p589_p3 }
  0x2c   : > { %4338 = sst [smem:[#allocation52_spill]] %s3840_s30  ;;  %p2472_p7 = scmp.ge.s32.totalorder %s3637_s28, 1 }
  0x2d   : > { %s4340_s5 = scalar_select %p3846_p6, 1, 0 }
  0x2e   : > { %p649_p8 = scmp.lt.s32.totalorder %s3637_s28, 3  ;;  %p2820_p9 = scmp.eq.s32.totalorder %s3823_s8, 0 }
  0x2f   : > { %4341 = sst [smem:[#allocation53_spill]] %s4340_s5  ;;  %s3639_s4 = smov [#allocation9]  }
  0x30   : > { %p3853_p10 = pnand %p2472_p7, %p649_p8  ;;  %s4343_s9 = sld [smem:[#allocation59_spill]] }
  0x31   : > { %s683_s30 = sshll.u32 %s3639_s4, 4  ;;  %s4344_s5 = sld [smem:[#allocation63_spill]]  ;;  %s684_s30 = int_to_ptr.vmem [resolvable:$true] %s683_s30 }
  0x32   : > { %p2758_p11 = pneg %p3853_p10  ;;  %s4346_s11 = sld [smem:[#allocation65_spill]] }
  0x33   : > { %s3640_s24 = smov [#allocation12]   ;;  %s4347_s13 = sld [smem:[#allocation67_spill]] }
  0x34   : > { %p3867_p12 = pnand %p2820_p9, %p2758_p11  ;;  %s715_s4 = sshll.u32 %s3640_s24, 4  ;;  %s716_s4 = int_to_ptr.vmem [resolvable:$true] %s715_s4 }
  0x35   : > { %s3641_s26 = smov [#allocation15]   ;;  %s3642_s6 = smov [#allocation18]  }
  0x36   : > { %s681_s0 = sshll.u32 %s4343_s9, 4  ;;  %s741_s25 = sshll.u32 %s3641_s26, 4  ;;  %s682_s0 = int_to_ptr.hbm [resolvable:$true] %s681_s0  ;;  %s742_s25 = int_to_ptr.vmem [resolvable:$true] %s741_s25 }
  0x37   : > { %s713_s27 = sshll.u32 %s4344_s5, 4  ;;  %s767_s24 = sshll.u32 %s3642_s6, 4  ;;  %s714_s27 = int_to_ptr.hbm [resolvable:$true] %s713_s27  ;;  %s768_s24 = int_to_ptr.vmem [resolvable:$true] %s767_s24 }
  0x38   : > { %s739_s9 = sshll.u32 %s4346_s11, 4  ;;  %s4348_s15 = sld [smem:[#allocation69_spill]]  ;;  %s740_s9 = int_to_ptr.hbm [resolvable:$true] %s739_s9 }
  0x39   : > { %2764 = dma.hbm_to_vmem [thread:$0]  (!%p3867_p12), %s682_s0, 16, %s684_s30, [#allocation10]  }
  0x3a   : > { %2770 = dma.hbm_to_vmem [thread:$0]  (!%p3867_p12), %s714_s27, 16, %s716_s4, [#allocation13]  }
  0x3b   : > { %s765_s5 = sshll.u32 %s4347_s13, 4  ;;  %s815_s4 = sshll.u32 %s4290_s17, 4  ;;  %s766_s5 = int_to_ptr.hbm [resolvable:$true] %s765_s5  ;;  %s816_s4 = int_to_ptr.hbm [resolvable:$true] %s815_s4 }
  0x3c   : > { %2776 = dma.hbm_to_vmem [thread:$0]  (!%p3867_p12), %s740_s9, 16, %s742_s25, [#allocation16]  }
  0x3d   : > { %2782 = dma.hbm_to_vmem [thread:$0]  (!%p3867_p12), %s766_s5, 16, %s768_s24, [#allocation19]  }
  0x3e   : > { %s791_s30 = sshll.u32 %s4348_s15, 4  ;;  %s3643_s26 = smov [#allocation21]   ;;  %s792_s30 = int_to_ptr.hbm [resolvable:$true] %s791_s30 }
  0x3f   : > { %s793_s7 = sshll.u32 %s3643_s26, 4  ;;  %s3644_s25 = smov [#allocation24]   ;;  %s794_s7 = int_to_ptr.vmem [resolvable:$true] %s793_s7 }
  0x40   : > { %2788 = dma.hbm_to_vmem [thread:$0]  (!%p3867_p12), %s792_s30, 16, %s794_s7, [#allocation22]  }
  0x41   : > { %s817_s9 = sshll.u32 %s3644_s25, 4  ;;  %s841_s6 = sshll.u32 %s4292_s19, 4  ;;  %s818_s9 = int_to_ptr.vmem [resolvable:$true] %s817_s9  ;;  %s842_s6 = int_to_ptr.hbm [resolvable:$true] %s841_s6 }
  0x42   : > { %2794 = dma.hbm_to_vmem [thread:$0]  (!%p3867_p12), %s816_s4, 16, %s818_s9, [#allocation25]  }
  0x43   : > { %s868_s1 = sshll.u32 %s4295_s22, 4  ;;  %s3645_s27 = smov [#allocation27]   ;;  %s869_s1 = int_to_ptr.hbm [resolvable:$true] %s868_s1 }
  0x44   : > { %s843_s0 = sshll.u32 %s3645_s27, 4  ;;  %s3646_s30 = smov [#allocation30]   ;;  %s844_s0 = int_to_ptr.vmem [resolvable:$true] %s843_s0 }
  0x45   : > { %2800 = dma.hbm_to_vmem [thread:$0]  (!%p3867_p12), %s842_s6, 16, %s844_s0, [#allocation28]  }
  0x46   : > { %s870_s26 = sshll.u32 %s3646_s30, 4  ;;  %s4349_s11 = sld [smem:[#allocation58_spill]]  ;;  %s871_s26 = int_to_ptr.vmem [resolvable:$true] %s870_s26 }
  0x47   : > { %2806 = dma.hbm_to_vmem [thread:$0]  (!%p3867_p12), %s869_s1, 16, %s871_s26, [#allocation31]  }
  0x48   : > { %s3647_s4 = smov [#allocation6]   ;;  %s4350_s27 = sld [smem:[#allocation60_spill]] }
  0x49   : > { %s668_s9 = sshll.u32 %s3647_s4, 4  ;;  %s3648_s6 = smov 64   ;;  %s669_s9 = int_to_ptr.vmem [resolvable:$true] %s668_s9 }
  0x4a   : > { %s3649_s0 = smov 4   ;;  %s3650_s30 = smov [#allocation11]  }
  0x4b   : > { %s694_s7 = sshll.u32 %s3650_s30, 4  ;;  %s4351_s26 = sld [smem:[#allocation64_spill]]  ;;  %s695_s7 = int_to_ptr.vmem [resolvable:$true] %s694_s7 }
  0x4c   : > { %s666_s29 = sshll.u32 %s4349_s11, 4  ;;  %s4352_s12 = sld [smem:[#allocation66_spill]]  ;;  %s667_s29 = int_to_ptr.hbm [resolvable:$true] %s666_s29 }
  0x4d   : > { %2761 = dma.hbm_to_vmem [thread:$0]  (!%p3867_p12), %s667_s29, 256, %s669_s9, [#allocation7], %s3648_s6, %s3648_s6, %s3649_s0  }
  0x4e   : > { %s692_s13 = sshll.u32 %s4350_s27, 4  ;;  %s3651_s29 = smov [#allocation14]   ;;  %s693_s13 = int_to_ptr.hbm [resolvable:$true] %s692_s13 }
  0x4f   : > { %2767 = dma.hbm_to_vmem [thread:$0]  (!%p3867_p12), %s693_s13, 256, %s695_s7, [#allocation10], %s3648_s6, %s3648_s6, %s3649_s0  }
  0x50   : > { %s726_s9 = sshll.u32 %s3651_s29, 4  ;;  %s3652_s27 = smov [#allocation17]   ;;  %s727_s9 = int_to_ptr.vmem [resolvable:$true] %s726_s9 }
  0x51   : > { %s724_s11 = sshll.u32 %s4351_s26, 4  ;;  %s752_s30 = sshll.u32 %s3652_s27, 4  ;;  %s725_s11 = int_to_ptr.hbm [resolvable:$true] %s724_s11  ;;  %s753_s30 = int_to_ptr.vmem [resolvable:$true] %s752_s30 }
  0x52   : > { %s750_s24 = sshll.u32 %s4352_s12, 4  ;;  %s4353_s14 = sld [smem:[#allocation68_spill]]  ;;  %s751_s24 = int_to_ptr.hbm [resolvable:$true] %s750_s24 }
  0x53   : > { %2773 = dma.hbm_to_vmem [thread:$0]  (!%p3867_p12), %s725_s11, 256, %s727_s9, [#allocation13], %s3648_s6, %s3648_s6, %s3649_s0  }
  0x54   : > { %2779 = dma.hbm_to_vmem [thread:$0]  (!%p3867_p12), %s751_s24, 256, %s753_s30, [#allocation16], %s3648_s6, %s3648_s6, %s3649_s0  }
  0x55   : > { %s4354_s16 = sld [smem:[#allocation70_spill]]  ;;  %s3653_s5 = smov [#allocation20]  }
  0x56   : > { %s778_s11 = sshll.u32 %s3653_s5, 4  ;;  %s3654_s29 = smov [#allocation23]   ;;  %s779_s11 = int_to_ptr.vmem [resolvable:$true] %s778_s11 }
  0x57   : > { %s805_s9 = sshll.u32 %s3654_s29, 4  ;;  %s826_s24 = sshll.u32 %s4291_s18, 4  ;;  %s806_s9 = int_to_ptr.vmem [resolvable:$true] %s805_s9  ;;  %s827_s24 = int_to_ptr.hbm [resolvable:$true] %s826_s24 }
  0x58   : > { %s776_s13 = sshll.u32 %s4353_s14, 4  ;;  %s856_s7 = sshll.u32 %s4294_s21, 4  ;;  %s777_s13 = int_to_ptr.hbm [resolvable:$true] %s776_s13  ;;  %s857_s7 = int_to_ptr.hbm [resolvable:$true] %s856_s7 }
  0x59   : > { %2785 = dma.hbm_to_vmem [thread:$0]  (!%p3867_p12), %s777_s13, 256, %s779_s11, [#allocation19], %s3648_s6, %s3648_s6, %s3649_s0  }
  0x5a   : > { %s3655_s26 = smov [#allocation26]   ;;  %s3656_s13 = smov [#allocation29]  }
  0x5b   : > { %s803_s4 = sshll.u32 %s4354_s16, 4  ;;  %s828_s5 = sshll.u32 %s3655_s26, 4  ;;  %s804_s4 = int_to_ptr.hbm [resolvable:$true] %s803_s4  ;;  %s829_s5 = int_to_ptr.vmem [resolvable:$true] %s828_s5 }
  0x5c   : > { %2791 = dma.hbm_to_vmem [thread:$0]  (!%p3867_p12), %s804_s4, 16, %s806_s9, [#allocation22]  }
  0x5d   : > { %2797 = dma.hbm_to_vmem [thread:$0]  (!%p3867_p12), %s827_s24, 256, %s829_s5, [#allocation25], %s3648_s6, %s3648_s6, %s3649_s0  }
  0x5e   : > { %s858_s11 = sshll.u32 %s3656_s13, 4  ;;  %s880_s4 = sshll.u32 %s4296_s23, 4  ;;  %s859_s11 = int_to_ptr.vmem [resolvable:$true] %s858_s11  ;;  %s881_s4 = int_to_ptr.hbm [resolvable:$true] %s880_s4 }
  0x5f   : > { %2803 = dma.hbm_to_vmem [thread:$0]  (!%p3867_p12), %s857_s7, 16, %s859_s11, [#allocation28]  }
  0x60   : > { %s3657_s9 = smov [#allocation32]   ;;  %910 = sbr.rel (%p3853_p10) target bundleno = 3058 (0xbf2), region = 116 }
  0x61   : > { %s882_s25 = sshll.u32 %s3657_s9, 4  ;;  %s883_s25 = int_to_ptr.vmem [resolvable:$true] %s882_s25 }
  0x62   : > { %2809 = dma.hbm_to_vmem [thread:$0]  (!%p3867_p12), %s881_s4, 16, %s883_s25, [#allocation31]  }
  0x65   : > { %3580 = dma.done.wait (%p2820_p9), [#allocation7], 256  }
  0x66   : > { %3582 = vsyncadd (%p2820_p9), [#allocation7], 4294967040 }
  0x67   : > { %3584 = dma.done.wait (%p2820_p9), [#allocation10], 272  }
  0x68   : > { %3586 = vsyncadd (%p2820_p9), [#allocation10], 4294967024 }
  0x69   : > { %3588 = dma.done.wait (%p2820_p9), [#allocation13], 272  }
  0x6a   : > { %3590 = vsyncadd (%p2820_p9), [#allocation13], 4294967024 }
  0x6b   : > { %3592 = dma.done.wait (%p2820_p9), [#allocation16], 272  }
  0x6c   : > { %3594 = vsyncadd (%p2820_p9), [#allocation16], 4294967024 }
  0x6d   : > { %3596 = dma.done.wait (%p2820_p9), [#allocation19], 272  }
  0x6e   : > { %3598 = vsyncadd (%p2820_p9), [#allocation19], 4294967024 }
  0x6f   : > { %3600 = dma.done.wait (%p2820_p9), [#allocation22], 32  }
  0x70   : > { %3602 = vsyncadd (%p2820_p9), [#allocation22], 4294967264 }
  0x71   : > { %3604 = dma.done.wait (%p2820_p9), [#allocation25], 272  }
  0x72   : > { %3606 = vsyncadd (%p2820_p9), [#allocation25], 4294967024 }
  0x73   : > { %3608 = dma.done.wait (%p2820_p9), [#allocation28], 32  }
  0x74   : > { %3610 = vsyncadd (%p2820_p9), [#allocation28], 4294967264 }
  0x75   : > { %3612 = dma.done.wait (%p2820_p9), [#allocation31], 32  }
  0x76   : > { %3614 = vsyncadd (%p2820_p9), [#allocation31], 4294967264  ;;  %p1075_p13 = scmp.lt.s32.totalorder %s3823_s8, 1  ;;  %s4355_s24 = sld [smem:[#allocation54_spill]]  ;;  %v2661_v1 = vld [vmem:[#allocation6 + $0x8] sm:$0xff]  ;;  %v2660_v3 = vld [vmem:[#allocation6] sm:$0xff] }
  0x77   : > { %s4356_s26 = sld [smem:[#allocation56_spill]]  ;;  %1153 = vmatpush.bf16.msra.mxu1 %v2661_v1  ;;  %vm1107_vm0 = vcmask 261120   ;;  %v2916_v7 = vld [vmem:[#allocation9] ss:$0 sm:$0xff]  ;;  %vm1125_vm1 = vcmask 257024   ;;  %vm1199_vm2 = vcmask 64512  }
  0x78   : > { %s4008_s28 = scalar_select %p1075_p13, %s3823_s8, 1  ;;  %v2663_v37 = vld [vmem:[#allocation11 + $0x8] sm:$0xff]  ;;  %v2662_v38 = vld [vmem:[#allocation11] sm:$0xff]  ;;  %vm1237_vm3 = vcmask 1043456   ;;  %vm1330_vm4 = vcmask 130112   ;;  %vm1407_vm5 = vcmask 195712  }
  0x79   : > { %s4357_s27 = sld [smem:[#allocation57_spill]]  ;;  %s3658_s4 = smov 112   ;;  %1188 = vmatpush.bf16.msra.mxu2 %v2663_v37  ;;  %vm1484_vm6 = vcmask 261312   ;;  %vm1676_vm11 = vcmask 130048   ;;  %vm2064_vm15 = vcmask 523264  }
  0x7a   : > { %s2512_s10 = sshll.u32 %s4008_s28, 3  ;;  %s3659_s9 = smov 120  }
  0x7b   : > { %1154 = vmatpush.bf16.msra.mxu1 %v2660_v3  ;;  %s3660_s25 = smov 104   ;;  %s4358_s0 = sld [smem:[#allocation61_spill]] }
  0x7c   : > { %s1078_s30 = scalar_lea.vmem %s4355_s24, %s2512_s10  ;;  %s4059_s24 = sand.u32 1, %s3629_s3  }
  0x7d   : > { %v2659_v0 = vld [vmem:[%s4356_s26 + $0x8] sm:$0xff]  ;;  %v2658_v2 = vld [vmem:[%s4356_s26] sm:$0xff]  ;;  %1189 = vmatpush.bf16.msra.mxu2 %v2662_v38  ;;  %s4312_s7 = smov 8   ;;  %s3662_s5 = smov 24  }
  0x7e   : > { %1117 = vmatpush.bf16.msra.mxu0 %v2659_v0  ;;  %v4020_v4 = vld [vmem:[%s1078_s30] sm:$0xff]  ;;  %s2510_s30 = sshll.u32 %s4059_s24, 5  ;;  %s3663_s13 = smov 16  }
  0x7f   : > { %v1086_v5 = vpack.c.bf16 %v4020_v4, %v4020_v4  ;;  %v2915_v6 = vld [vmem:[%s4357_s27] ss:$0 sm:$0xff]  ;;  %s4064_s1 = scalar_lea.vmem [#allocation34], %s2510_s30  ;;  %s2657_s11 = sshll.u32 %s4008_s28, 4 }
  0x80   : > { %s4359_s10 = sld [smem:[#allocation55_spill]]  ;;  %s2120_s28 = sand.u32 1, %s3823_s8  }
  0x81   : > { %2532 = vmatmul.msk.bf16.vlgmr.msra.gmra.mxu1 %vm1107_vm0, %v1086_v5  ;;  %2541 = vmatmul.msk.bf16.vlgmr.msra.gmra.mxu2 %vm1107_vm0, %v1086_v5 }
  0x82   : > { %1118 = vmatpush.bf16.msra.mxu0 %v2658_v2 }
  0x85   : > { %2523 = vmatmul.msk.bf16.vlgmr.msra.gmra.mxu0 %vm1107_vm0, %v1086_v5 }
  0x86   : > { %s1083_s6 = scalar_lea.vmem %s4359_s10, %s2657_s11  ;;  %s4360_s11 = sld [smem:[#allocation62_spill]] }
  0xfe   : > { %v1156_v9 = vpop.f32.mrf.mxu1 }
  0xff   : > { %v1157_v11 = vadd.f32 %v2916_v7, %v1156_v9 }
 0x101   : > { %v1160_v13 = vpack.c.bf16 %v1157_v11, %v1157_v11 }
 0x102   : > { %v1120_v8 = vpop.f32.mrf.mxu0 }
 0x103   : > { %v1121_v10 = vadd.f32 %v2915_v6, %v1120_v8  ;;  %1161 = vst.msk [vmem:[#allocation3] sm:$0xf] %vm1125_vm1, %v1160_v13  ;;  %v2917_v6 = vld [vmem:[%s4358_s0] ss:$0 sm:$0xff]  ;;  %s4198_s0 = sshll.u32 %s3823_s8, 3 }
 0x104   : > { %v1191_v7 = vpop.f32.mrf.mxu2 }
 0x105   : > { %v1124_v12 = vpack.c.bf16 %v1121_v10, %v1121_v10  ;;  %v1192_v8 = vadd.f32 %v2917_v6, %v1191_v7 }
 0x106   : > { %v1158_v15 = vpop.f32.mrf.mxu1 }
 0x107   : > { %1126 = vst.msk [vmem:[#allocation2] sm:$0xf] %vm1125_vm1, %v1124_v12  ;;  %v1195_v9 = vpack.c.bf16 %v1192_v8, %v1192_v8 }
 0x109   : > { %1196 = vst.msk [vmem:[#allocation4] sm:$0xf] %vm1125_vm1, %v1195_v9 }
 0x10a   : > { %v1122_v14 = vpop.f32.mrf.mxu0  ;;  %v1198_v17 = vld [vmem:[#allocation3] sm:$0xf] }
 0x10b   : > { %v1333_v18 = vld [vmem:[#allocation3] sm:$0xf]  ;;  %v1204_v21 = vsel %vm1199_vm2, %v1198_v17, 0 }
 0x10c   : > { %v1256_v19 = vld [vmem:[#allocation3] sm:$0xf]  ;;  %v1340_v22 = vunpack.c.l.b16 %v1333_v18  ;;  %1213 = vmatpush.bf16.xpose.msra.mxu3 %v1204_v21  ;;  %v1193_v10 = vpop.f32.mrf.mxu2 }
 0x10d   : > { %v1263_v23 = vunpack.c.l.b16 %v1256_v19  ;;  %v1410_v29 = vld [vmem:[#allocation3] sm:$0xf]  ;;  %v3664_v10 = vmov 32.0  }
 0x10e   : > { %v1332_v16 = vld [vmem:[#allocation2] sm:$0xf]  ;;  %v1341_v27 = vpack.c.b16 %v1340_v22, %v1340_v22  ;;  %v1417_v33 = vunpack.c.l.b16 %v1410_v29 }
 0x10f   : > { %v1335_v20 = vunpack.c.l.b16 %v1332_v16  ;;  %v1409_v24 = vld [vmem:[#allocation2] sm:$0xf]  ;;  %v1264_v28 = vpack.c.b16 %v1263_v23, %v1263_v23 }
 0x110   : > { %v1255_v26 = vld [vmem:[#allocation2] sm:$0xf]  ;;  %v1412_v30 = vunpack.c.l.b16 %v1409_v24  ;;  %1342 = vrot.lane.b32.xlu1 %v1341_v27, %s3658_s4  ;;  %v1418_v36 = vpack.c.b16 %v1417_v33, %v1417_v33  ;;  %v1233_v11 = vld [vmem:[#allocation4] sm:$0xf] }
 0x111   : > { %v1336_v25 = vpack.c.b16 %v1335_v20, %v1335_v20  ;;  %1265 = vrot.lane.b32.xlu0 %v1264_v28, %s3659_s9  ;;  %v1258_v31 = vunpack.c.l.b16 %v1255_v26  ;;  %v1197_v32 = vld [vmem:[#allocation2] sm:$0xf]  ;;  %v1239_v12 = vsel %vm1237_vm3, %v1233_v11, 0  ;;  %v1301_v16 = vld [vmem:[#allocation4] sm:$0xf] }
 0x112   : > { %v1413_v34 = vpack.c.b16 %v1412_v30, %v1412_v30  ;;  %1248 = vmatpush.bf16.msrb.mxu0 %v1239_v12  ;;  %v1303_v17 = vunpack.c.l.b16 %v1301_v16  ;;  %v1378_v38 = vld [vmem:[#allocation4] sm:$0xf]  ;;  %v2667_v11 = vld [vmem:[#allocation17 + $0x8] sm:$0xff] }
 0x113   : > { %1337 = vrot.lane.b32.xlu2 %v1336_v25, %s3658_s4  ;;  %2542 = vmatmul.msk.bf16.vlgmr.msra.gmra.mxu3 %vm1199_vm2, %v1197_v32  ;;  %v1259_v35 = vpack.c.b16 %v1258_v31, %v1258_v31  ;;  %v1527_v12 = vld [vmem:[%s1083_s6] sm:$0xff] }
 0x114   : > { %v1304_v18 = vpack.c.b16 %v1303_v17, %v1303_v17 }
 0x118   : > { %1419 = vrot.lane.b32.xlu1 %v1418_v36, %s3660_s25 }
 0x119   : > { %1260 = vrot.lane.b32.xlu0 %v1259_v35, %s3659_s9  ;;  %v1455_v35 = vld [vmem:[#allocation4] sm:$0xf] }
 0x11a   : > { %v1457_v36 = vunpack.c.l.b16 %v1455_v35 }
 0x11b   : > { %1414 = vrot.lane.b32.xlu2 %v1413_v34, %s3660_s25 }
 0x11c   : > { %v1458_v37 = vpack.c.b16 %v1457_v36, %v1457_v36 }
 0x16d   : > { %v1338_v43 = vpop.permute.xlu2 %1337 }
 0x175   : > { %v1415_v49 = vpop.permute.xlu2 %1414 }
 0x182   : > { %v1343_v39 = vpop.permute.xlu1 %1342 }
 0x183   : > { %v1266_v40 = vpop.permute.xlu0 %1265  ;;  %v1348_v42 = vsel %vm1199_vm2, %v1343_v39, 0  ;;  %v1380_v39 = vunpack.c.l.b16 %v1378_v38 }
 0x184   : > { %v1271_v41 = vsel %vm1199_vm2, %v1266_v40, 0  ;;  %1357 = vmatpush.bf16.xpose.msrb.mxu3 %v1348_v42 }
 0x185   : > { %1280 = vmatpush.bf16.xpose.msrb.mxu1 %v1271_v41  ;;  %v1381_v40 = vpack.c.b16 %v1380_v39, %v1380_v39 }
 0x18a   : > { %v1420_v44 = vpop.permute.xlu1 %1419 }
 0x18b   : > { %v1261_v45 = vpop.permute.xlu0 %1260  ;;  %v1425_v46 = vsel %vm1199_vm2, %v1420_v44, 0  ;;  %2547 = vmatmul.msk.bf16.vlgmr.msrb.gmra.mxu3 %vm1199_vm2, %v1338_v43 }
 0x18c   : > { %2544 = vmatmul.msk.bf16.vlgmr.msrb.gmra.mxu1 %vm1199_vm2, %v1261_v45 }
 0x18d   : > { %1434 = vmatpush.bf16.xpose.msra.mxu1 %v1425_v46 }
 0x196   : > { %v1215_v47 = vpop.f32.mrf.mxu3 }
 0x197   : > { %v1219_v48 = vmul.f32 0.35355338, %v1215_v47 }
 0x199   : > { %v1220_v50 = vsel %vm1199_vm2, %v1219_v48, -inf }
 0x19a   : > { %1221 = vmax.xlane.f32.xlu1 %v1220_v50 }
 0x19c   : > { %2550 = vmatmul.msk.bf16.vlgmr.msra.gmra.mxu1 %vm1199_vm2, %v1415_v49 }
 0x19e   : > { %v1217_v51 = vpop.f32.mrf.mxu3 }
 0x209   : > { %v1282_v52 = vpop.f32.mrf.mxu1 }
 0x20a   : > { %v1286_v53 = vmul.f32 0.35355338, %v1282_v52 }
 0x20c   : > { %v1287_v54 = vsel %vm1199_vm2, %v1286_v53, -inf }
 0x20d   : > { %1288 = vmax.xlane.f32.xlu0 %v1287_v54  ;;  %v1222_v55 = vpop.xlane.xlu1 %1221 }
 0x20e   : > { %v1359_v56 = vpop.f32.mrf.mxu3  ;;  %v1223_v57 = vsub.f32 %v1219_v48, %v1222_v55 }
 0x20f   : > { %v1363_v2 = vmul.f32 0.35355338, %v1359_v56 }
 0x210   : > { %v1224_v59 = vmul.f32 1.442695, %v1223_v57 }
 0x211   : > { %v1284_v58 = vpop.f32.mrf.mxu1  ;;  %v1364_v5 = vsel %vm1199_vm2, %v1363_v2, -inf }
 0x212   : > { %2929 = vpow2.f32 %v1224_v59 }
 0x216   : > { %v1361_v60 = vpop.f32.mrf.mxu3 }
 0x218   : > { %v2930_v62 = vpop.eup %2929 }
 0x219   : > { %v1436_v61 = vpop.f32.mrf.mxu1  ;;  %v1226_v0 = vsel %vm1199_vm2, %v2930_v62, 0.0 }
 0x21a   : > { %v1440_v63 = vmul.f32 0.35355338, %v1436_v61  ;;  %1227 = vadd.xlane.f32.xlu1 %v1226_v0 }
 0x21c   : > { %v1441_v1 = vsel %vm1199_vm2, %v1440_v63, -inf }
 0x21d   : > { %1442 = vmax.xlane.f32.xlu2 %v1441_v1 }
 0x221   : > { %v1438_v3 = vpop.f32.mrf.mxu1 }
 0x225   : > { %1365 = vmax.xlane.f32.xlu2 %v1364_v5 }
 0x23d   : > { %1305 = vrot.lane.b32.xlu2 %v1304_v18, %s3659_s9 }
 0x280   : > { %v1289_v13 = vpop.xlane.xlu0 %1288 }
 0x281   : > { %v1290_v14 = vsub.f32 %v1286_v53, %v1289_v13  ;;  %v1528_v13 = vld [vmem:[%s1083_s6 + $0x8] sm:$0xff]  ;;  %s2151_s6 = sshll.u32 %s4064_s1, 4  ;;  %s2152_s6 = int_to_ptr.vmem [resolvable:$true] %s2151_s6 }
 0x282   : > { %v4098_v16 = vpack.c.bf16 %v1528_v13, %v1527_v12 }
 0x283   : > { %v1291_v15 = vmul.f32 1.442695, %v1290_v14  ;;  %v2666_v14 = vld [vmem:[#allocation17] sm:$0xff] }
 0x285   : > { %2931 = vpow2.f32 %v1291_v15 }
 0x28b   : > { %v2932_v19 = vpop.eup %2931 }
 0x28c   : > { %v1293_v20 = vsel %vm1199_vm2, %v2932_v19, 0.0 }
 0x28d   : > { %1294 = vadd.xlane.f32.xlu0 %v1293_v20  ;;  %v1228_v21 = vpop.xlane.xlu1 %1227 }
 0x28e   : > { %2933 = vrcp.f32 %v1228_v21 }
 0x290   : > { %v1443_v22 = vpop.xlane.xlu2 %1442 }
 0x291   : > { %v1444_v23 = vsub.f32 %v1440_v63, %v1443_v22 }
 0x293   : > { %v1445_v24 = vmul.f32 1.442695, %v1444_v23 }
 0x294   : > { %v2934_v25 = vpop.eup %2933 }
 0x295   : > { %2935 = vpow2.f32 %v1445_v24  ;;  %v1230_v26 = vmul.f32 %v2934_v25, %v2930_v62 }
 0x297   : > { %1231 = vst.msk [vmem:[%s4064_s1] sm:$0xff] %vm1199_vm2, %v1230_v26  ;;  %v1232_v29 = vpack.c.bf16 %v1230_v26, %v1230_v26  ;;  %v2665_v26 = vld [vmem:[#allocation14 + $0x8] sm:$0xff] }
 0x298   : > { %v1366_v27 = vpop.xlane.xlu2 %1365  ;;  %1560 = vmatpush.bf16.msra.mxu3 %v2665_v26 }
 0x299   : > { %v1367_v28 = vsub.f32 %v1363_v2, %v1366_v27  ;;  %2543 = vmatmul.msk.bf16.vlgmr.msrb.gmra.mxu0 %vm1199_vm2, %v1232_v29  ;;  %v2664_v27 = vld [vmem:[#allocation14] sm:$0xff] }
 0x29b   : > { %v2936_v30 = vpop.eup %2935  ;;  %v1368_v31 = vmul.f32 1.442695, %v1367_v28  ;;  %v2920_v28 = vld [vmem:[#allocation18] ss:$0 sm:$0xff] }
 0x29c   : > { %v1447_v32 = vsel %vm1199_vm2, %v2936_v30, 0.0  ;;  %1561 = vmatpush.bf16.msra.mxu3 %v2664_v27 }
 0x29d   : > { %2937 = vpow2.f32 %v1368_v31  ;;  %1448 = vadd.xlane.f32.xlu0 %v1447_v32 }
 0x2a0   : > { %v1306_v41 = vpop.permute.xlu2 %1305 }
 0x2a1   : > { %v1311_v42 = vsel %vm1237_vm3, %v1306_v41, 0 }
 0x2a2   : > { %1320 = vmatpush.bf16.msrb.mxu2 %v1311_v42 }
 0x2a3   : > { %v2938_v33 = vpop.eup %2937 }
 0x2a4   : > { %v1370_v34 = vsel %vm1199_vm2, %v2938_v33, 0.0 }
 0x2a5   : > { %1371 = vadd.xlane.f32.xlu1 %v1370_v34 }
 0x2b1   : > { %1459 = vrot.lane.b32.xlu0 %v1458_v37, %s3660_s25 }
 0x2be   : > { %1382 = vrot.lane.b32.xlu1 %v1381_v40, %s3658_s4 }
 0x300   : > { %v1295_v43 = vpop.xlane.xlu0 %1294 }
 0x301   : > { %2939 = vrcp.f32 %v1295_v43 }
 0x307   : > { %v2940_v44 = vpop.eup %2939 }
 0x308   : > { %v1297_v45 = vmul.f32 %v2940_v44, %v2932_v19 }
 0x30a   : > { %2545 = vst.msk [vmem:[%s4064_s1 + $0x8] sm:$0xff] %vm1199_vm2, %v1297_v45  ;;  %v1300_v46 = vpack.c.bf16 %v1297_v45, %v1297_v45 }
 0x30c   : > { %2546 = vmatmul.msk.bf16.vlgmr.msrb.gmra.mxu2 %vm1199_vm2, %v1300_v46  ;;  %v2918_v46 = vld [vmem:[%s4360_s11] ss:$0 sm:$0xff] }
 0x310   : > { %v1449_v47 = vpop.xlane.xlu0 %1448 }
 0x311   : > { %2941 = vrcp.f32 %v1449_v47 }
 0x316   : > { %v1250_v50 = vpop.f32.mrf.mxu0 }
 0x317   : > { %v2942_v48 = vpop.eup %2941  ;;  %1254 = vst.msk [vmem:[#allocation5] sm:$0xff] %vm1199_vm2, %v1250_v50 }
 0x318   : > { %v1451_v49 = vmul.f32 %v2942_v48, %v2936_v30  ;;  %v1372_v51 = vpop.xlane.xlu1 %1371 }
 0x319   : > { %2943 = vrcp.f32 %v1372_v51 }
 0x31a   : > { %2551 = vst.msk [vmem:[%s4064_s1 + $0x18] sm:$0xff] %vm1199_vm2, %v1451_v49  ;;  %v1454_v57 = vpack.c.bf16 %v1451_v49, %v1451_v49  ;;  %2945 = vrcp.f32 %v3664_v10  ;;  %v2919_v49 = vld [vmem:[#allocation12] ss:$0 sm:$0xff] }
 0x31e   : > { %v1252_v54 = vpop.f32.mrf.mxu0 }
 0x31f   : > { %v2944_v52 = vpop.eup %2943 }
 0x320   : > { %v1374_v53 = vmul.f32 %v2944_v52, %v2938_v33  ;;  %v2946_v15 = vpop.eup %2945 }
 0x321   : > { %v1494_v17 = vmul.f32 32.0, %v2946_v15  ;;  %vm1498_vm7 = vweird.f32 %v2946_v15 }
 0x322   : > { %2548 = vst.msk [vmem:[%s4064_s1 + $0x10] sm:$0xff] %vm1199_vm2, %v1374_v53  ;;  %v1377_v60 = vpack.c.bf16 %v1374_v53, %v1374_v53 }
 0x323   : > { %v1460_v55 = vpop.permute.xlu0 %1459 }
 0x324   : > { %v1465_v56 = vsel %vm1237_vm3, %v1460_v55, 0  ;;  %v2921_v55 = vld [vmem:[#allocation15] ss:$0 sm:$0xff] }
 0x325   : > { %1474 = vmatpush.bf16.msra.mxu2 %v1465_v56 }
 0x328   : > { %2552 = vmatmul.msk.bf16.vlgmr.msra.gmra.mxu2 %vm1199_vm2, %v1454_v57 }
 0x330   : > { %v1383_v58 = vpop.permute.xlu1 %1382 }
 0x331   : > { %v1388_v59 = vsel %vm1237_vm3, %v1383_v58, 0 }
 0x332   : > { %1397 = vmatpush.bf16.msra.mxu0 %v1388_v59 }
 0x335   : > { %2549 = vmatmul.msk.bf16.vlgmr.msra.gmra.mxu0 %vm1199_vm2, %v1377_v60 }
 0x336   : > { %1598 = vmatpush.bf16.msrb.mxu0 %v2667_v11 }
 0x33a   : > { %1599 = vmatpush.bf16.msrb.mxu0 %v2666_v14  ;;  %v2669_v14 = vld [vmem:[#allocation20 + $0x8] sm:$0xff] }
 0x33b   : > { %1636 = vmatpush.bf16.msrb.mxu1 %v2669_v14 }
 0x345   : > { %2570 = vmatmul.msk.bf16.vlgmr.msrb.gmra.mxu0 %vm1107_vm0, %v4098_v16 }
 0x38f   : > { %v1322_v61 = vpop.f32.mrf.mxu2 }
 0x390   : > { %1327 = vrot.lane.b32.xlu2 %v1322_v61, %s4312_s7 }
 0x397   : > { %v1324_v62 = vpop.f32.mrf.mxu2 }
 0x3ab   : > { %v1476_v63 = vpop.f32.mrf.mxu2 }
 0x3ac   : > { %1481 = vrot.lane.b32.xlu2 %v1476_v63, %s3662_s5 }
 0x3b2   : > { %v1399_v0 = vpop.f32.mrf.mxu0 }
 0x3b3   : > { %1404 = vrot.lane.b32.xlu0 %v1399_v0, %s3663_s13  ;;  %v1478_v1 = vpop.f32.mrf.mxu2 }
 0x3ba   : > { %v1401_v2 = vpop.f32.mrf.mxu0 }
 0x3c2   : > { %v1601_v29 = vpop.f32.mrf.mxu0 }
 0x3c3   : > { %v1602_v32 = vadd.f32 %v2920_v28, %v1601_v29 }
 0x3c5   : > { %v1606_v34 = vpack.c.bf16 %v1602_v32, %v1602_v32 }
 0x3c7   : > { %1608 = vst.msk [vmem:[#allocation3] sm:$0xf] %vm1125_vm1, %v1606_v34 }
 0x3ca   : > { %v1603_v35 = vpop.f32.mrf.mxu0 }
 0x3cb   : > { %v1604_v36 = vadd.f32 %v2920_v28, %v1603_v35 }
 0x3cd   : > { %v1607_v37 = vpack.c.bf16 %v1604_v36, %v1604_v36 }
 0x3cf   : > { %1609 = vst.msk [vmem:[#allocation3 + $0x4] sm:$0xf] %vm1125_vm1, %v1607_v37 }
 0x3d6   : > { %v2672_v43 = vld [vmem:[#allocation3] sm:$0xff] }
 0x3d7   : > { %v2670_v44 = vld [vmem:[#allocation3] sm:$0xff]  ;;  %1728 = vrot.lane.b32.xlu2 %v2672_v43, %s3659_s9 }
 0x3d8   : > { %v1660_v47 = vsel %vm1199_vm2, %v2670_v44, 0  ;;  %v2674_v52 = vld [vmem:[#allocation3] sm:$0xff] }
 0x3d9   : > { %1669 = vmatpush.bf16.xpose.msrb.mxu2 %v1660_v47  ;;  %v2676_v11 = vld [vmem:[#allocation3] sm:$0xff] }
 0x3df   : > { %1808 = vrot.lane.b32.xlu2 %v2674_v52, %s3658_s4 }
 0x3ea   : > { %v1328_v3 = vpop.permute.xlu2 %1327 }
 0x3eb   : > { %1331 = vst.msk [vmem:[#allocation5] sm:$0xff] %vm1330_vm4, %v1328_v3 }
 0x406   : > { %v1482_v6 = vpop.permute.xlu2 %1481 }
 0x425   : > { %v1405_v5 = vpop.permute.xlu0 %1404 }
 0x426   : > { %1408 = vst.msk [vmem:[#allocation5] sm:$0xff] %vm1407_vm5, %v1405_v5 }
 0x427   : > { %1485 = vst.msk [vmem:[#allocation5] sm:$0xff] %vm1484_vm6, %v1482_v6 }
 0x42e   : > { %v1486_v7 = vld [vmem:[#allocation5] sm:$0xff] }
 0x42f   : > { %v1487_v8 = vadd.f32 %v1486_v7, %v4020_v4  ;;  %v1495_v4 = vsub.f32 1.0, %v1494_v17 }
 0x431   : > { %v1490_v9 = vsel %vm1107_vm0, %v1487_v8, 0.0  ;;  %v1496_v18 = vmul.f32 %v2946_v15, %v1495_v4  ;;  %v1729_v58 = vpop.permute.xlu2 %1728 }
 0x432   : > { %1491 = vadd.xlane.f32.xlu1 %v1490_v9  ;;  %v1734_v59 = vsel %vm1199_vm2, %v1729_v58, 0 }
 0x433   : > { %v1497_v19 = vadd.f32 %v2946_v15, %v1496_v18  ;;  %1743 = vmatpush.bf16.xpose.msra.mxu0 %v1734_v59 }
 0x435   : > { %v4102_v20 = vsel %vm1498_vm7, %v2946_v15, %v1497_v19  ;;  %v2668_v15 = vld [vmem:[#allocation20] sm:$0xff] }
 0x436   : > { %1637 = vmatpush.bf16.msrb.mxu1 %v2668_v15 }
 0x439   : > { %v1809_v62 = vpop.permute.xlu2 %1808  ;;  %2579 = vmatmul.msk.bf16.vlgmr.msrb.gmra.mxu1 %vm1107_vm0, %v4098_v16 }
 0x43a   : > { %v1814_v63 = vsel %vm1199_vm2, %v1809_v62, 0 }
 0x43b   : > { %1823 = vmatpush.bf16.xpose.msra.mxu2 %v1814_v63 }
 0x4a5   : > { %v1492_v21 = vpop.xlane.xlu1 %1491 }
 0x4a6   : > { %v1500_v22 = vmul.f32 %v4102_v20, %v1492_v21 }
 0x4a8   : > { %v1501_v23 = vsub.f32 %v1487_v8, %v1500_v22 }
 0x4aa   : > { %v1502_v24 = vmul.f32 %v1501_v23, %v1501_v23 }
 0x4ac   : > { %v1503_v25 = vsel %vm1107_vm0, %v1502_v24, 0.0 }
 0x4ad   : > { %1504 = vadd.xlane.f32.xlu0 %v1503_v25 }
 0x520   : > { %v1505_v30 = vpop.xlane.xlu0 %1504 }
 0x521   : > { %v1506_v31 = vmul.f32 %v1505_v30, %v4102_v20  ;;  %v2922_v30 = vld [vmem:[#allocation21] ss:$0 sm:$0xff] }
 0x523   : > { %v1507_v33 = vadd.f32 1e-05, %v1506_v31  ;;  %v1639_v31 = vpop.f32.mrf.mxu1 }
 0x525   : > { %2947 = vrsqrt.f32 %v1507_v33  ;;  %vm1514_vm9 = vweird.f32 %v1507_v33 }
 0x52b   : > { %v2948_v38 = vpop.eup %2947 }
 0x52c   : > { %v1509_v39 = vmul.f32 %v2948_v38, %v1507_v33  ;;  %vm1515_vm8 = vweird.f32 %v2948_v38  ;;  %v1640_v33 = vadd.f32 %v2922_v30, %v1639_v31 }
 0x52d   : > { %vm1516_vm10 = vmor %vm1514_vm9, %vm1515_vm8 }
 0x52e   : > { %v1510_v40 = vmul.f32 %v2948_v38, %v1509_v39  ;;  %v1644_v35 = vpack.c.bf16 %v1640_v33, %v1640_v33 }
 0x530   : > { %v1511_v41 = vmul.f32 0.5, %v1510_v40  ;;  %1646 = vst.msk [vmem:[#allocation4] sm:$0xf] %vm1125_vm1, %v1644_v35 }
 0x532   : > { %v1512_v42 = vsub.f32 1.5, %v1511_v41 }
 0x534   : > { %v1513_v45 = vmul.f32 %v2948_v38, %v1512_v42 }
 0x536   : > { %v1517_v48 = vsel %vm1516_vm10, %v2948_v38, %v1513_v45  ;;  %v1641_v38 = vpop.f32.mrf.mxu1 }
 0x537   : > { %v1518_v50 = vmul.f32 %v1517_v48, %v1501_v23  ;;  %v1642_v40 = vadd.f32 %v2922_v30, %v1641_v38 }
 0x539   : > { %v1522_v51 = vmul.f32 %v2918_v46, %v1518_v50  ;;  %v1645_v43 = vpack.c.bf16 %v1642_v40, %v1642_v40 }
 0x53b   : > { %v4114_v53 = vadd.f32 %v2919_v49, %v1522_v51  ;;  %1647 = vst.msk [vmem:[#allocation4 + $0x4] sm:$0xf] %vm1125_vm1, %v1645_v43  ;;  %v2678_v43 = vld [vmem:[#allocation26] sm:$0xff] }
 0x53d   : > { %v1530_v54 = vpack.c.bf16 %v4114_v53, %v4114_v53 }
 0x53f   : > { %2561 = vmatmul.msk.bf16.vlgmr.msra.gmra.mxu3 %vm1107_vm0, %v1530_v54 }
 0x542   : > { %v2671_v46 = vld [vmem:[#allocation4] sm:$0xff] }
 0x543   : > { %1708 = vmatpush.bf16.msrb.mxu3 %v2671_v46  ;;  %v2673_v48 = vld [vmem:[#allocation4] sm:$0xff] }
 0x544   : > { %v2675_v63 = vld [vmem:[#allocation4] sm:$0xff] }
 0x545   : > { %v2682_v46 = vld [vmem:[%s4293_s20 + $0x10] sm:$0xff] }
 0x5c2   : > { %v1563_v56 = vpop.f32.mrf.mxu3 }
 0x5c3   : > { %v1564_v57 = vadd.f32 %v2921_v55, %v1563_v56 }
 0x5c5   : > { %v1567_v60 = vpack.c.bf16 %v1564_v57, %v1564_v57 }
 0x5c7   : > { %1568 = vst.msk [vmem:[#allocation2] sm:$0xf] %vm1125_vm1, %v1567_v60 }
 0x5ca   : > { %v1565_v61 = vpop.f32.mrf.mxu3 }
 0x5ce   : > { %v1648_v0 = vld [vmem:[#allocation2] sm:$0xf] }
 0x5cf   : > { %v1875_v1 = vld [vmem:[#allocation2] sm:$0xf]  ;;  %2584 = vmatmul.msk.bf16.vlgmr.msrb.gmra.mxu2 %vm1199_vm2, %v1648_v0 }
 0x5d0   : > { %v1715_v2 = vld [vmem:[#allocation2] sm:$0xf]  ;;  %v1879_v3 = vunpack.c.l.b16 %v1875_v1 }
 0x5d1   : > { %v1719_v5 = vunpack.c.l.b16 %v1715_v2  ;;  %v1795_v8 = vld [vmem:[#allocation2] sm:$0xf] }
 0x5d2   : > { %v1880_v6 = vpack.c.b16 %v1879_v3, %v1879_v3  ;;  %v1799_v9 = vunpack.c.l.b16 %v1795_v8  ;;  %v2677_v8 = vld [vmem:[#allocation4] sm:$0xff] }
 0x5d3   : > { %v1720_v7 = vpack.c.b16 %v1719_v5, %v1719_v5 }
 0x5d4   : > { %1881 = vrot.lane.b32.xlu1 %v1880_v6, %s3660_s25  ;;  %v1800_v10 = vpack.c.b16 %v1799_v9, %v1799_v9 }
 0x5d5   : > { %1721 = vrot.lane.b32.xlu2 %v1720_v7, %s3659_s9 }
 0x5dd   : > { %1801 = vrot.lane.b32.xlu2 %v1800_v10, %s3658_s4 }
 0x5e5   : > { %1888 = vrot.lane.b32.xlu2 %v2676_v11, %s3660_s25 }
 0x62f   : > { %v1722_v12 = vpop.permute.xlu2 %1721 }
 0x630   : > { %2594 = vmatmul.msk.bf16.vlgmr.msra.gmra.mxu0 %vm1199_vm2, %v1722_v12 }
 0x637   : > { %v1802_v13 = vpop.permute.xlu2 %1801 }
 0x638   : > { %2605 = vmatmul.msk.bf16.vlgmr.msra.gmra.mxu2 %vm1199_vm2, %v1802_v13 }
 0x63f   : > { %v1889_v17 = vpop.permute.xlu2 %1888 }
 0x640   : > { %v1894_v4 = vsel %vm1199_vm2, %v1889_v17, 0 }
 0x641   : > { %1903 = vmatpush.bf16.xpose.msrb.mxu0 %v1894_v4 }
 0x646   : > { %v1882_v18 = vpop.permute.xlu1 %1881 }
 0x648   : > { %2616 = vmatmul.msk.bf16.vlgmr.msrb.gmra.mxu0 %vm1199_vm2, %v1882_v18 }
 0x652   : > { %v1671_v19 = vpop.f32.mrf.mxu2 }
 0x653   : > { %v1675_v21 = vmul.f32 0.35355338, %v1671_v19 }
 0x655   : > { %v1677_v22 = vsel %vm1676_vm11, %v1675_v21, -inf }
 0x656   : > { %1678 = vmax.xlane.f32.xlu0 %v1677_v22 }
 0x65a   : > { %v1673_v23 = vpop.f32.mrf.mxu2 }
 0x6ad   : > { %v1745_v24 = vpop.f32.mrf.mxu0 }
 0x6ae   : > { %v1749_v25 = vmul.f32 0.35355338, %v1745_v24 }
 0x6b0   : > { %v1750_v26 = vsel %vm1676_vm11, %v1749_v25, -inf }
 0x6b1   : > { %1751 = vmax.xlane.f32.xlu2 %v1750_v26 }
 0x6b5   : > { %v1747_v27 = vpop.f32.mrf.mxu0 }
 0x6bb   : > { %v1825_v28 = vpop.f32.mrf.mxu2 }
 0x6bc   : > { %v1829_v29 = vmul.f32 0.35355338, %v1825_v28 }
 0x6be   : > { %v1830_v16 = vsel %vm1676_vm11, %v1829_v29, -inf }
 0x6bf   : > { %1831 = vmax.xlane.f32.xlu0 %v1830_v16 }
 0x6c3   : > { %v1827_v32 = vpop.f32.mrf.mxu2 }
 0x6c5   : > { %v1905_v34 = vpop.f32.mrf.mxu0 }
 0x6c6   : > { %v1909_v36 = vmul.f32 0.35355338, %v1905_v34 }
 0x6c8   : > { %v1910_v37 = vsel %vm1676_vm11, %v1909_v36, -inf }
 0x6c9   : > { %1911 = vmax.xlane.f32.xlu0 %v1910_v37  ;;  %v1679_v39 = vpop.xlane.xlu0 %1678 }
 0x6ca   : > { %v1680_v41 = vsub.f32 %v1675_v21, %v1679_v39 }
 0x6cc   : > { %v1681_v44 = vmul.f32 1.442695, %v1680_v41 }
 0x6cd   : > { %v1907_v42 = vpop.f32.mrf.mxu0 }
 0x6ce   : > { %2949 = vpow2.f32 %v1681_v44  ;;  %v2679_v42 = vld [vmem:[#allocation26 + $0x8] sm:$0xff]  ;;  %v2683_v44 = vld [vmem:[%s4293_s20 + $0x18] sm:$0xff] }
 0x6cf   : > { %2019 = vmatpush.bf16.msrb.mxu2 %v2679_v42 }
 0x6d3   : > { %2020 = vmatpush.bf16.msrb.mxu2 %v2678_v43 }
 0x6d4   : > { %v2950_v45 = vpop.eup %2949 }
 0x6d5   : > { %v1683_v47 = vsel %vm1676_vm11, %v2950_v45, 0.0 }
 0x6d6   : > { %1684 = vadd.xlane.f32.xlu1 %v1683_v47 }
 0x6dd   : > { %1771 = vrot.lane.b32.xlu0 %v2673_v48, %s3659_s9  ;;  %s4148_s9 = scalar_lea.vmem [#allocation36], %s2510_s30 }
 0x724   : > { %v1752_v49 = vpop.xlane.xlu2 %1751 }
 0x725   : > { %v1753_v50 = vsub.f32 %v1749_v25, %v1752_v49 }
 0x727   : > { %v1754_v51 = vmul.f32 1.442695, %v1753_v50 }
 0x729   : > { %2951 = vpow2.f32 %v1754_v51 }
 0x72f   : > { %v2952_v52 = vpop.eup %2951 }
 0x730   : > { %v1756_v54 = vsel %vm1676_vm11, %v2952_v52, 0.0 }
 0x731   : > { %1757 = vadd.xlane.f32.xlu0 %v1756_v54 }
 0x732   : > { %v1832_v55 = vpop.xlane.xlu0 %1831 }
 0x733   : > { %v1833_v56 = vsub.f32 %v1829_v29, %v1832_v55  ;;  %v2923_v55 = vld [vmem:[#allocation23] ss:$0 sm:$0xff] }
 0x735   : > { %v1834_v57 = vmul.f32 1.442695, %v1833_v56 }
 0x737   : > { %2953 = vpow2.f32 %v1834_v57  ;;  %v2924_v57 = vld [vmem:[#allocation24] ss:$0 sm:$0xff] }
 0x73c   : > { %v1912_v58 = vpop.xlane.xlu0 %1911 }
 0x73d   : > { %v2954_v59 = vpop.eup %2953  ;;  %v1913_v60 = vsub.f32 %v1909_v36, %v1912_v58 }
 0x73e   : > { %v1836_v61 = vsel %vm1676_vm11, %v2954_v59, 0.0 }
 0x73f   : > { %v1914_v62 = vmul.f32 1.442695, %v1913_v60  ;;  %1837 = vadd.xlane.f32.xlu2 %v1836_v61 }
 0x741   : > { %2955 = vpow2.f32 %v1914_v62  ;;  %v2681_v62 = vld [vmem:[%s4293_s20 + $0x8] sm:$0xff] }
 0x745   : > { %1851 = vrot.lane.b32.xlu0 %v2675_v63, %s3658_s4  ;;  %v2680_v63 = vld [vmem:[%s4293_s20] sm:$0xff] }
 0x747   : > { %v2956_v0 = vpop.eup %2955 }
 0x748   : > { %v1916_v1 = vsel %vm1676_vm11, %v2956_v0, 0.0 }
 0x749   : > { %1917 = vadd.xlane.f32.xlu2 %v1916_v1  ;;  %v1685_v2 = vpop.xlane.xlu1 %1684 }
 0x74a   : > { %2957 = vrcp.f32 %v1685_v2 }
 0x74f   : > { %v1772_v3 = vpop.permute.xlu0 %1771 }
 0x750   : > { %1784 = vmatpush.bf16.msra.mxu1 %v1772_v3  ;;  %v2958_v5 = vpop.eup %2957 }
 0x751   : > { %v1687_v6 = vmul.f32 %v2958_v5, %v2950_v45 }
 0x753   : > { %1688 = vst.msk [vmem:[%s4148_s9] sm:$0xff] %vm1676_vm11, %v1687_v6  ;;  %v1689_v7 = vpack.c.bf16 %v1687_v6, %v1687_v6 }
 0x755   : > { %2589 = vmatmul.msk.bf16.vlgmr.msrb.gmra.mxu3 %vm1676_vm11, %v1689_v7  ;;  %v2926_v7 = vld [vmem:[#allocation29] ss:$0 sm:$0xff] }
 0x761   : > { %1931 = vrot.lane.b32.xlu2 %v2677_v8, %s3660_s25  ;;  %s4361_s25 = sld [smem:[#allocation72_spill]] }
 0x767   : > { %s2150_s30 = scalar_lea.hbm %s4361_s25, %s4198_s0  ;;  %s3499_s8 = scalar_lea.hbm %s4361_s25, 64 }
 0x7a4   : > { %v1758_v9 = vpop.xlane.xlu0 %1757 }
 0x7a5   : > { %2959 = vrcp.f32 %v1758_v9 }
 0x7ab   : > { %v2960_v10 = vpop.eup %2959 }
 0x7ac   : > { %v1760_v11 = vmul.f32 %v2960_v10, %v2952_v52 }
 0x7ae   : > { %2595 = vst.msk [vmem:[%s4148_s9 + $0x8] sm:$0xff] %vm1676_vm11, %v1760_v11  ;;  %v1763_v12 = vpack.c.bf16 %v1760_v11, %v1760_v11 }
 0x7b0   : > { %2600 = vmatmul.msk.bf16.vlgmr.msra.gmra.mxu1 %vm1676_vm11, %v1763_v12 }
 0x7b2   : > { %v1838_v13 = vpop.xlane.xlu2 %1837 }
 0x7b3   : > { %2961 = vrcp.f32 %v1838_v13 }
 0x7b7   : > { %v1852_v14 = vpop.permute.xlu0 %1851 }
 0x7b8   : > { %1864 = vmatpush.bf16.msra.mxu3 %v1852_v14 }
 0x7b9   : > { %v2962_v15 = vpop.eup %2961 }
 0x7ba   : > { %v1840_v17 = vmul.f32 %v2962_v15, %v2954_v59 }
 0x7bc   : > { %2606 = vst.msk [vmem:[%s4148_s9 + $0x10] sm:$0xff] %vm1676_vm11, %v1840_v17  ;;  %v1843_v4 = vpack.c.bf16 %v1840_v17, %v1840_v17  ;;  %v1918_v18 = vpop.xlane.xlu2 %1917  ;;  %2072 = vmatpush.bf16.msrb.mxu3 %v2683_v44 }
 0x7bd   : > { %2963 = vrcp.f32 %v1918_v18 }
 0x7be   : > { %2611 = vmatmul.msk.bf16.vlgmr.msra.gmra.mxu3 %vm1676_vm11, %v1843_v4 }
 0x7c0   : > { %2073 = vmatpush.bf16.msrb.mxu3 %v2682_v46 }
 0x7c3   : > { %v2964_v19 = vpop.eup %2963 }
 0x7c4   : > { %v1920_v21 = vmul.f32 %v2964_v19, %v2956_v0  ;;  %v1932_v22 = vpop.permute.xlu2 %1931  ;;  %2074 = vmatpush.bf16.msrb.mxu3 %v2681_v62  ;;  %v2925_v0 = vld [vmem:[#allocation27] ss:$0 sm:$0xff] }
 0x7c5   : > { %1944 = vmatpush.bf16.msrb.mxu1 %v1932_v22 }
 0x7c6   : > { %2617 = vst.msk [vmem:[%s4148_s9 + $0x18] sm:$0xff] %vm1676_vm11, %v1920_v21  ;;  %v1923_v23 = vpack.c.bf16 %v1920_v21, %v1920_v21 }
 0x7c8   : > { %2622 = vmatmul.msk.bf16.vlgmr.msrb.gmra.mxu1 %vm1676_vm11, %v1923_v23  ;;  %2075 = vmatpush.bf16.msrb.mxu3 %v2680_v63 }
 0x7d8   : > { %v1710_v24 = vpop.f32.mrf.mxu3 }
 0x7d9   : > { %1714 = vst.msk [vmem:[#allocation5] sm:$0xff] %vm1199_vm2, %v1710_v24 }
 0x7e0   : > { %v1712_v25 = vpop.f32.mrf.mxu3 }
 0x82d   : > { %v1786_v26 = vpop.f32.mrf.mxu1 }
 0x82e   : > { %1791 = vrot.lane.b32.xlu0 %v1786_v26, %s4312_s7 }
 0x835   : > { %v1788_v27 = vpop.f32.mrf.mxu1 }
 0x841   : > { %v1866_v28 = vpop.f32.mrf.mxu3 }
 0x842   : > { %1871 = vrot.lane.b32.xlu1 %v1866_v28, %s3663_s13  ;;  %s4204_s13 = scalar_lea.sflag [#allocation35], %s2120_s28 }
 0x845   : > { %v1946_v29 = vpop.f32.mrf.mxu1 }
 0x846   : > { %1951 = vrot.lane.b32.xlu0 %v1946_v29, %s3662_s5  ;;  %s2153_s5 = sshll.u32 %s2150_s30, 4  ;;  %s2154_s5 = int_to_ptr.hbm [resolvable:$true] %s2153_s5 }
 0x847   : > { %s3493_s29 = sshra.s32 %s2154_s5, 4  ;;  %s3494_s29 = int_to_ptr.hbm [resolvable:$true] %s3493_s29 }
 0x848   : > { %s3495_s27 = scalar_lea.hbm %s3494_s29, 32  ;;  %p3500_p3 = scmp.lt.s32.totalorder %s3494_s29, %s4361_s25 }
 0x849   : > { %v1868_v16 = vpop.f32.mrf.mxu3  ;;  %p3496_p0 = scmp.ne.s32.totalorder %s3494_s29, %s3495_s27  ;;  %p3501_p4 = scmp.lt.s32.totalorder %s3499_s8, %s3495_s27 }
 0x84b   : > { %p3497_p1 = pnand %p3496_p0, %p3842_p5  ;;  %p3502_p7 = por %p3501_p4, %p3500_p3 }
 0x84d   : > { %v1948_v30 = vpop.f32.mrf.mxu1  ;;  %p3498_p2 = pneg %p3497_p1 }
 0x84f   : > { %p3503_p8 = pnand %p3502_p7, %p3498_p2 }
 0x8a0   : > { %v1792_v31 = vpop.permute.xlu0 %1791 }
 0x8a1   : > { %1794 = vst.msk [vmem:[#allocation5] sm:$0xff] %vm1330_vm4, %v1792_v31 }
 0x8b4   : > { %v1872_v32 = vpop.permute.xlu1 %1871 }
 0x8b5   : > { %1874 = vst.msk [vmem:[#allocation5] sm:$0xff] %vm1407_vm5, %v1872_v32 }
 0x8b8   : > { %v1952_v33 = vpop.permute.xlu0 %1951 }
 0x8b9   : > { %1954 = vst.msk [vmem:[#allocation5] sm:$0xff] %vm1484_vm6, %v1952_v33 }
 0x8c0   : > { %v1955_v34 = vld [vmem:[#allocation5] sm:$0xff] }
 0x8c1   : > { %v1956_v35 = vadd.f32 %v1955_v34, %v4114_v53 }
 0x8c3   : > { %v1959_v36 = vsel %vm1107_vm0, %v1956_v35, 0.0 }
 0x8c4   : > { %1960 = vadd.xlane.f32.xlu0 %v1959_v36 }
 0x937   : > { %v1961_v37 = vpop.xlane.xlu0 %1960 }
 0x938   : > { %v1962_v38 = vmul.f32 %v1961_v37, %v4102_v20 }
 0x93a   : > { %v1963_v39 = vsub.f32 %v1956_v35, %v1962_v38 }
 0x93c   : > { %v1964_v40 = vmul.f32 %v1963_v39, %v1963_v39 }
 0x93e   : > { %v1965_v41 = vsel %vm1107_vm0, %v1964_v40, 0.0 }
 0x93f   : > { %1966 = vadd.xlane.f32.xlu2 %v1965_v41 }
 0x9b2   : > { %v1967_v53 = vpop.xlane.xlu2 %1966 }
 0x9b3   : > { %v1968_v45 = vmul.f32 %v1967_v53, %v4102_v20 }
 0x9b5   : > { %v1969_v47 = vadd.f32 1e-05, %v1968_v45 }
 0x9b7   : > { %2965 = vrsqrt.f32 %v1969_v47  ;;  %vm1976_vm13 = vweird.f32 %v1969_v47 }
 0x9bd   : > { %v2966_v48 = vpop.eup %2965 }
 0x9be   : > { %v1971_v49 = vmul.f32 %v2966_v48, %v1969_v47  ;;  %vm1977_vm12 = vweird.f32 %v2966_v48 }
 0x9bf   : > { %vm1978_vm14 = vmor %vm1976_vm13, %vm1977_vm12 }
 0x9c0   : > { %v1972_v50 = vmul.f32 %v2966_v48, %v1971_v49 }
 0x9c2   : > { %v1973_v51 = vmul.f32 0.5, %v1972_v50 }
 0x9c4   : > { %v1974_v52 = vsub.f32 1.5, %v1973_v51 }
 0x9c6   : > { %v1975_v54 = vmul.f32 %v2966_v48, %v1974_v52 }
 0x9c8   : > { %v1979_v56 = vsel %vm1978_vm14, %v2966_v48, %v1975_v54 }
 0x9c9   : > { %v1980_v58 = vmul.f32 %v1979_v56, %v1963_v39 }
 0x9cb   : > { %v1984_v59 = vmul.f32 %v2923_v55, %v1980_v58 }
 0x9cd   : > { %v1988_v60 = vadd.f32 %v2924_v57, %v1984_v59 }
 0x9cf   : > { %v1989_v61 = vpack.c.bf16 %v1988_v60, %v1988_v60 }
 0x9d1   : > { %2631 = vmatmul.msk.bf16.vlgmr.msrb.gmra.mxu2 %vm1107_vm0, %v1989_v61 }
 0xa54   : > { %v2022_v1 = vpop.f32.mrf.mxu2 }
 0xa55   : > { %v2023_v2 = vadd.f32 %v2925_v0, %v2022_v1 }
 0xa57   : > { %v2026_v3 = vmax.f32 %v2023_v2, 0.0 }
 0xa59   : > { %v2027_v5 = vpack.c.bf16 %v2026_v3, %v2026_v3 }
 0xa5b   : > { %2648 = vmatmul.msk.bf16.vlgmr.msrb.gmra.mxu3 %vm2064_vm15, %v2027_v5 }
 0xa5c   : > { %v2024_v6 = vpop.f32.mrf.mxu2 }
 0xade   : > { %v2077_v8 = vpop.f32.mrf.mxu3 }
 0xadf   : > { %v2078_v9 = vadd.f32 %v2926_v7, %v2077_v8 }
 0xae1   : > { %v2081_v10 = vadd.f32 %v2078_v9, %v1988_v60 }
 0xae3   : > { %v2084_v11 = vsel %vm1107_vm0, %v2081_v10, 0.0 }
 0xae4   : > { %2085 = vadd.xlane.f32.xlu1 %v2084_v11 }
 0xae6   : > { %v2079_v12 = vpop.f32.mrf.mxu3 }
 0xb57   : > { %v2086_v13 = vpop.xlane.xlu1 %2085 }
 0xb58   : > { %v2087_v14 = vmul.f32 %v2086_v13, %v4102_v20 }
 0xb5a   : > { %v4190_v15 = vsub.f32 %v2081_v10, %v2087_v14 }
 0xb5c   : > { %v2089_v17 = vmul.f32 %v4190_v15, %v4190_v15 }
 0xb5e   : > { %v2090_v4 = vsel %vm1107_vm0, %v2089_v17, 0.0 }
 0xb5f   : > { %2091 = vadd.xlane.f32.xlu0 %v2090_v4 }
 0xb60   : > { %3506 = shalt.err (!%p3503_p8)
}
 0xb61   : > { %s3665_s28 = smov 128   ;;  %s3666_s11 = smov 256  }
 0xb62   : > { %s4362_s4 = smov 8   ;;  %s2167_s30 = sshll.u32 %s4148_s9, 4  ;;  %s2168_s30 = int_to_ptr.vmem [resolvable:$true] %s2167_s30 }
 0xb63   : > { %2753 = dma.vmem_to_hbm [thread:$0]  (%p3842_p5), %s2152_s6, 512, %s2154_s5, %s4204_s13, %s3665_s28, %s3666_s11, %s4362_s4  }
 0xb64   : > { %s4363_s14 = sld [smem:[#allocation73_spill]] }
 0xb6a   : > { %s2166_s12 = scalar_lea.hbm %s4363_s14, %s4198_s0  ;;  %s3527_s16 = scalar_lea.hbm %s4363_s14, 64 }
 0xb6b   : > { %s2169_s7 = sshll.u32 %s2166_s12, 4  ;;  %s2170_s7 = int_to_ptr.hbm [resolvable:$true] %s2169_s7 }
 0xb6c   : > { %s3521_s29 = sshra.s32 %s2170_s7, 4  ;;  %s3522_s29 = int_to_ptr.hbm [resolvable:$true] %s3521_s29 }
 0xb6d   : > { %s3523_s27 = scalar_lea.hbm %s3522_s29, 32  ;;  %p3528_p12 = scmp.lt.s32.totalorder %s3522_s29, %s4363_s14 }
 0xb6e   : > { %p3524_p9 = scmp.ne.s32.totalorder %s3522_s29, %s3523_s27  ;;  %p3529_p13 = scmp.lt.s32.totalorder %s3527_s16, %s3523_s27 }
 0xb70   : > { %p3525_p10 = pnand %p3524_p9, %p3842_p5  ;;  %p3530_p0 = por %p3529_p13, %p3528_p12 }
 0xb72   : > { %p3526_p11 = pneg %p3525_p10 }
 0xb74   : > { %p3531_p1 = pnand %p3530_p0, %p3526_p11 }
 0xb76   : > { %3534 = shalt.err (!%p3531_p1)
}
 0xb77   : > { %2754 = dma.vmem_to_hbm [thread:$0]  (%p3842_p5), %s2168_s30, 512, %s2170_s7, %s4204_s13, %s3665_s28, %s3666_s11, %s4362_s4   ;;  %v2927_v28 = vld [vmem:[#allocation30] ss:$0 sm:$0xff]  ;;  %v2928_v16 = vld [vmem:[#allocation32] ss:$0 sm:$0xff] }
 0xb78   : > { %s2509_s15 = sshll.u32 %s4059_s24, 3  ;;  %s4364_s13 = sld [smem:[#allocation71_spill]] }
 0xb79   : > { %s1060_s11 = scalar_lea.vmem [#allocation33], %s2509_s15  ;;  %s2116_s1 = scalar_lea.sflag [#allocation8], %s4059_s24 }
 0xb7a   : > { %s2138_s4 = sshll.u32 %s1060_s11, 4  ;;  %s2139_s4 = int_to_ptr.vmem [resolvable:$true] %s2138_s4 }
 0xb7e   : > { %s2136_s28 = scalar_lea.hbm %s4364_s13, %s4198_s0  ;;  %s3555_s29 = scalar_lea.hbm %s4364_s13, 16 }
 0xb7f   : > { %s2140_s30 = sshll.u32 %s2136_s28, 4  ;;  %s2141_s30 = int_to_ptr.hbm [resolvable:$true] %s2140_s30 }
 0xb80   : > { %s3549_s10 = sshra.s32 %s2141_s30, 4  ;;  %s3550_s10 = int_to_ptr.hbm [resolvable:$true] %s3549_s10 }
 0xb81   : > { %s3551_s12 = scalar_lea.hbm %s3550_s10, 8  ;;  %p3556_p7 = scmp.lt.s32.totalorder %s3550_s10, %s4364_s13 }
 0xb82   : > { %p3552_p2 = scmp.ne.s32.totalorder %s3550_s10, %s3551_s12  ;;  %p3557_p8 = scmp.lt.s32.totalorder %s3555_s29, %s3551_s12 }
 0xb84   : > { %p3553_p3 = pnand %p3552_p2, %p3842_p5  ;;  %p3558_p9 = por %p3557_p8, %p3556_p7 }
 0xb86   : > { %p3554_p4 = pneg %p3553_p3 }
 0xb88   : > { %p3559_p10 = pnand %p3558_p9, %p3554_p4 }
 0xbd2   : > { %v2092_v18 = vpop.xlane.xlu0 %2091 }
 0xbd3   : > { %v2093_v19 = vmul.f32 %v2092_v18, %v4102_v20 }
 0xbd5   : > { %v2094_v21 = vadd.f32 1e-05, %v2093_v19 }
 0xbd7   : > { %2967 = vrsqrt.f32 %v2094_v21  ;;  %vm2101_vm2 = vweird.f32 %v2094_v21 }
 0xbdd   : > { %v2968_v22 = vpop.eup %2967 }
 0xbde   : > { %v2096_v23 = vmul.f32 %v2968_v22, %v2094_v21  ;;  %vm2102_vm1 = vweird.f32 %v2968_v22 }
 0xbdf   : > { %vm2103_vm3 = vmor %vm2101_vm2, %vm2102_vm1 }
 0xbe0   : > { %v2097_v24 = vmul.f32 %v2968_v22, %v2096_v23 }
 0xbe2   : > { %v2098_v25 = vmul.f32 0.5, %v2097_v24 }
 0xbe4   : > { %v2099_v26 = vsub.f32 1.5, %v2098_v25 }
 0xbe6   : > { %v2100_v27 = vmul.f32 %v2968_v22, %v2099_v26 }
 0xbe8   : > { %v2104_v29 = vsel %vm2103_vm3, %v2968_v22, %v2100_v27 }
 0xbe9   : > { %v2105_v20 = vmul.f32 %v2104_v29, %v4190_v15 }
 0xbeb   : > { %v2109_v30 = vmul.f32 %v2927_v28, %v2105_v20 }
 0xbed   : > { %v2113_v31 = vadd.f32 %v2928_v16, %v2109_v30 }
 0xbef   : > { %2114 = vst.msk [vmem:[%s1060_s11] sm:$0xff] %vm1107_vm0, %v2113_v31 }
 0xbf0   : > { %3562 = shalt.err (!%p3559_p10)
}
 0xbf1   : > { %2752 = dma.vmem_to_hbm [thread:$0]  (%p3842_p5), %s2139_s4, 128, %s2141_s30, %s2116_s1  }
 0xbf2 PF: > { %s4365_s24 = sld [smem:[#allocation50_spill]] }
 0xbf3   : > { %s4366_s6 = sld [smem:[#allocation48_spill]] }
 0xbf8   : > { %p2854_p11 = scmp.ge.s32.totalorder %s4365_s24, 2 }
 0xbf9   : > { %s2184_s15 = sand.u32 1, %s4366_s6  }
 0xbfa   : > { %p2811_p12 = pnand %p2854_p11, %p3846_p6  ;;  %s2185_s16 = scalar_lea.sflag [#allocation8], %s2184_s15 }
 0xbfc   : > { %p2812_p13 = pneg %p2811_p12 }
 0xbfe   : > { %3616 = dma.done.wait (%p2812_p13), %s2185_s16, 128  }
 0xbff   : > { %3618 = vsyncadd (%p2812_p13), %s2185_s16, 4294967168  ;;  %s4368_s5 = sadd.s32 4294967294, %s4365_s24  }
 0xc00   : > { %s2194_s28 = sand.u32 1, %s4368_s5  }
 0xc01   : > { %s2195_s11 = scalar_lea.sflag [#allocation35], %s2194_s28 }
 0xc02   : > { %3620 = dma.done.wait (%p2812_p13), %s2195_s11, 1024  }
 0xc03   : > { %3622 = vsyncadd (%p2812_p13), %s2195_s11, 4294966272  ;;  %s4369_s28 = sld [smem:[#allocation51_spill]]  ;;  %s4372_s27 = smov %s3629_s3 }
 0xc04   : > { %s4370_s2 = sld [smem:[#allocation49_spill]] }
 0xc05   : > { %s4371_s7 = sld [smem:[#allocation52_spill]] }
 0xc09   : > { %p49_p5 = scmp.ge.s32.totalorder %s4369_s28, 4  }
 0xc0a   : > { %s4373_s3 = smov %s4370_s2 }
 0xc0b   :  { %51 = sbr.rel (!%p49_p5) target bundleno = 35 (0x23), region = 261 }
 0xc10   :  { %2211 = vsyncpa [#allocation7], 1 }
 0xc11   :  { %2213 = vsyncpa [#allocation7 + $0x1], 1 }
 0xc12   :  { %2214 = vsyncpa [#allocation10], 1 }
 0xc13   :  { %2215 = vsyncpa [#allocation13], 1 }
 0xc14   :  { %2216 = vsyncpa [#allocation16], 1 }
 0xc15   :  { %2217 = vsyncpa [#allocation19], 1 }
 0xc16   :  { %2218 = vsyncpa [#allocation22], 1 }
 0xc17   :  { %2219 = vsyncpa [#allocation25], 1 }
 0xc18   :  { %2220 = vsyncpa [#allocation28], 1 }
 0xc19   :  { %2221 = vsyncpa [#allocation31], 1 }
 0xc1a   :  { %2222 = vsyncpa [#allocation8], 1 }
 0xc1b   :  { %2224 = vsyncpa [#allocation8 + $0x1], 1 }
 0xc1c   :  { %2225 = vsyncpa [#allocation35], 1 }
 0xc1d   :  { %2227 = vsyncpa [#allocation35 + $0x1], 1 }

</bundles_post_ra>
